<compile_context>
chip_gen: v7x
topology: tpu7x:2x2x1
jax: 0.10.0
libtpu: 0.0.40
codegen_flags: <defaults>
</compile_context>

<pallas_src>
import functools

import jax
import jax.numpy as jnp
from jax.experimental import pallas as pl
from jax.experimental.pallas import tpu as pltpu


# ----------------------------------------------------------------------------
# Fused kernel: LSTM recurrence + ReLU + attention head, grid = (1,)
# ----------------------------------------------------------------------------
def fused_lstm_attn_kernel(x_ref, wih_ref, whh_ref, b_ref, w12_ref, b12_ref,
                           zmask_ref, out_ref, hs_ref, *, seq_len, batch):
    """Whole forward pass in one kernel; hidden states never leave VMEM.

    x_ref     : (S*Bp, I)  bf16  time-major, batch sublane-padded to Bp (mult of 8)
    wih_ref   : (I, 4H)    bf16  input->gates weight (pre-transposed, g cols *2)
    whh_ref   : (H, 4H)    bf16  hidden->gates weight (pre-transposed, g cols *2)
    b_ref     : (1, 4H)    f32   bih + bhh (g entries *2)
    w12_ref   : (H, 2*O)   bf16  [W1 | W2] concatenated (pre-transposed)
    b12_ref   : (1, 2*O)   f32   [b1 | b2]
    zmask_ref : (S*Bp, 1)  f32   0 for real rows, -1e30 for batch pad rows
    out_ref   : (8, 128)   f32   sublane/lane-dense padded result ([:O,:O] real)
    hs_ref    : (S*Bp, H)  f32   VMEM scratch: relu(h_t) for the attention head
    """
    Bp = x_ref.shape[0] // seq_len        # sublane-padded batch (multiple of 8)
    H = whh_ref.shape[0]
    O = w12_ref.shape[1] // 2

    # ---- Hoisted input projection: ONE bf16 matmul (f32 accumulate) for all
    # timesteps instead of a tiny matmul on the serial critical path each step.
    gx = (jnp.dot(x_ref[...], wih_ref[...], preferred_element_type=jnp.float32)
          + b_ref[...])                                        # (S*Bp, 4H) f32

    whh = whh_ref[...]                                         # load once (bf16)

    # Lane masks for the single-sigmoid gate trick (hoisted: built once, not
    # re-broadcast inside the loop).  g lanes: acts = 2*sigmoid(2x) - 1 = tanh(x).
    lane = jax.lax.broadcasted_iota(jnp.int32, (Bp, 4 * H), 1)
    is_g = (lane >= 2 * H) & (lane < 3 * H)
    act_scale = jnp.where(is_g, 2.0, 1.0).astype(jnp.float32)
    act_shift = jnp.where(is_g, -1.0, 0.0).astype(jnp.float32)

    h = jnp.zeros((Bp, H), jnp.float32)
    c = jnp.zeros((Bp, H), jnp.float32)

    # ---- Recurrence. seq_len is small & static, so a fully-unrolled Python
    # loop yields straight-line code with every slice index static and every
    # per-step slab a whole 8-sublane-aligned vreg.
    for t in range(seq_len):
        pre = gx[t * Bp:(t + 1) * Bp, :] + jnp.dot(
            h.astype(jnp.bfloat16), whh,
            preferred_element_type=jnp.float32)                # (Bp, 4H) f32
        # ONE sigmoid over the full 4H-wide vreg, then a lane-masked FMA turns
        # the (pre-scaled) g lanes into tanh.  2 EUP ops/step (this + tanh(c))
        # instead of 5.
        acts = jax.nn.sigmoid(pre) * act_scale + act_shift
        i = acts[:, 0:H]
        f = acts[:, H:2 * H]
        g = acts[:, 2 * H:3 * H]
        o = acts[:, 3 * H:4 * H]
        c = f * c + i * g
        h = o * jnp.tanh(c)
        # F.relu(x, inplace=True) affects only the emitted outputs, not the
        # recurrent h/c carry.  8-sublane-aligned full-lane-extent store.
        hs_ref[t * Bp:(t + 1) * Bp, :] = jnp.maximum(h, 0.0)

    # ---- Attention head: one fused bf16 matmul with [W1 | W2], softmax over
    # rows.  Batch-pad rows are pushed to -1e30 before the softmax so they get
    # zero attention weight.
    hs = hs_ref[...].astype(jnp.bfloat16)                      # (S*Bp, H)
    yz = (jnp.dot(hs, w12_ref[...], preferred_element_type=jnp.float32)
          + b12_ref[...])                                      # (S*Bp, 2*O)
    y = yz[:, 0:O]                                             # layer1(x)
    z = yz[:, O:2 * O] + zmask_ref[...]                        # layer2(x), masked
    z = z - jnp.max(z, axis=0, keepdims=True)
    e = jnp.exp(z)
    w = e / jnp.sum(e, axis=0, keepdims=True)                  # exact div, runs once
    # output_size == 1 (guarded in wrapper), so torch.t(w).mm(y) is a weighted sum.
    res = jnp.sum(w * y, axis=0, keepdims=True)                # (1, 1)
    # Full-vreg (8,128) unmasked store; real value sits at [:O, :O].
    out_ref[...] = jnp.broadcast_to(res, out_ref.shape)


# ----------------------------------------------------------------------------
# Wrapper: weight packing + single pallas_call
# ----------------------------------------------------------------------------
@jax.jit
def lstm_one_output_forward(x, params):
    S, B, I = x.shape
    H = params["whh"].shape[1]
    O = params["w1"].shape[0]
    # TODO(synk): output_size > 1 needs a dot_general (w^T @ y) in the kernel.
    assert O == 1, "kernel's final reduction implements w^T @ y for output_size==1 only"

    # Sublane-pad the batch to a multiple of 8 so every per-timestep slab is a
    # whole (8,128)-aligned vreg inside the kernel.
    Bp = max(8, ((B + 7) // 8) * 8)
    x_p = jnp.pad(x, ((0, 0), (0, Bp - B), (0, 0)))
    x2d = x_p.reshape(S * Bp, I).astype(jnp.bfloat16)          # time-major flatten

    # Pre-scale g-gate columns by 2 (exact, exponent shift) so the kernel can
    # run a single sigmoid over the whole gates vreg (2*sigmoid(2x)-1 == tanh).
    gscale = jnp.ones((4 * H,), jnp.float32).at[2 * H:3 * H].set(2.0)
    wih_t = (params["wih"].T * gscale).astype(jnp.bfloat16)    # (I, 4H)
    whh_t = (params["whh"].T * gscale).astype(jnp.bfloat16)    # (H, 4H)
    bias = ((params["bih"] + params["bhh"]) * gscale).reshape(1, 4 * H)  # f32

    w12 = jnp.concatenate([params["w1"].T, params["w2"].T],
                          axis=1).astype(jnp.bfloat16)         # (H, 2O)
    b12 = jnp.concatenate([params["b1"], params["b2"]]).reshape(1, 2 * O)

    # Additive softmax mask: 0 on real batch rows, -1e30 on pad rows.
    pad_neg = jnp.where(jnp.arange(Bp) < B, 0.0, -1e30).astype(jnp.float32)
    zmask = jnp.tile(pad_neg, (S,)).reshape(S * Bp, 1)

    kernel = functools.partial(fused_lstm_attn_kernel, seq_len=S, batch=B)

    # NOTE (scaling / v7x): at these sizes everything is a few KB of VMEM.  If
    # S/B/H grow, chunk the hoisted gx over S (pltpu.emit_pipeline or a grid
    # axis), budget tiles against v7x's 64 MiB total / ~32 MiB scoped VMEM
    # (half of v5e/v6e) and set vmem_limit_bytes explicitly; add a leading
    # "parallel" batch grid axis so v7x's second TensorCore takes half the
    # batch instead of idling behind grid=(1,).
    out_padded = pl.pallas_call(
        kernel,
        out_shape=jax.ShapeDtypeStruct((8, 128), jnp.float32),
        grid_spec=pltpu.PrefetchScalarGridSpec(
            num_scalar_prefetch=0,
            grid=(1,),
            in_specs=[
                pl.BlockSpec((S * Bp, I), lambda i: (0, 0)),
                pl.BlockSpec((I, 4 * H), lambda i: (0, 0)),
                pl.BlockSpec((H, 4 * H), lambda i: (0, 0)),
                pl.BlockSpec((1, 4 * H), lambda i: (0, 0)),
                pl.BlockSpec((H, 2 * O), lambda i: (0, 0)),
                pl.BlockSpec((1, 2 * O), lambda i: (0, 0)),
                pl.BlockSpec((S * Bp, 1), lambda i: (0, 0)),
            ],
            out_specs=pl.BlockSpec((8, 128), lambda i: (0, 0)),
            scratch_shapes=[pltpu.VMEM((S * Bp, H), jnp.float32)],  # hs (padded)
        ),
        compiler_params=pltpu.CompilerParams(
            dimension_semantics=("arbitrary",),
        ),
    )(x2d, wih_t, whh_t, bias, w12, b12, zmask)

    return out_padded[:O, :O]


# ----------------------------------------------------------------------------
# Pure-JAX references (mirror the PyTorch module; optionally mirror the
# kernel's bf16 MXU operands for a tight numerical check)
# ----------------------------------------------------------------------------
def ref_forward(x, p, *, mxu_bf16=False):
    S, B, _ = x.shape
    H = p["whh"].shape[1]
    cast = (lambda a: a.astype(jnp.bfloat16)) if mxu_bf16 else (lambda a: a)

    def mm(a, b):
        return jnp.dot(cast(a), cast(b), preferred_element_type=jnp.float32)

    h = jnp.zeros((B, H), jnp.float32)
    c = jnp.zeros((B, H), jnp.float32)
    outs = []
    for t in range(S):
        gates = mm(x[t], p["wih"].T) + p["bih"] + mm(h, p["whh"].T) + p["bhh"]
        i = jax.nn.sigmoid(gates[:, :H])
        f = jax.nn.sigmoid(gates[:, H:2 * H])
        g = jnp.tanh(gates[:, 2 * H:3 * H])
        o = jax.nn.sigmoid(gates[:, 3 * H:])
        c = f * c + i * g
        h = o * jnp.tanh(c)
        outs.append(h)
    hs = jnp.maximum(jnp.stack(outs), 0.0).reshape(S * B, H)
    y = mm(hs, p["w1"].T) + p["b1"]
    z = mm(hs, p["w2"].T) + p["b2"]
    w = jax.nn.softmax(z, axis=0)
    return w.T @ y


if __name__ == "__main__":
    S, B, I, H, O = 8, 2, 8, 32, 1   # seq, batch, input_size, hidden_size, output_size

    key = jax.random.PRNGKey(0)
    keys = jax.random.split(key, 9)
    k = 1.0 / jnp.sqrt(H)  # PyTorch default uniform(-1/sqrt(H), 1/sqrt(H))

    params = {
        "wih": jax.random.uniform(keys[0], (4 * H, I), jnp.float32, -k, k),
        "whh": jax.random.uniform(keys[1], (4 * H, H), jnp.float32, -k, k),
        "bih": jax.random.uniform(keys[2], (4 * H,), jnp.float32, -k, k),
        "bhh": jax.random.uniform(keys[3], (4 * H,), jnp.float32, -k, k),
        "w1":  jax.random.uniform(keys[4], (O, H), jnp.float32, -k, k),
        "b1":  jax.random.uniform(keys[5], (O,), jnp.float32, -k, k),
        "w2":  jax.random.uniform(keys[6], (O, H), jnp.float32, -k, k),
        "b2":  jax.random.uniform(keys[7], (O,), jnp.float32, -k, k),
    }
    x = jax.random.normal(keys[8], (S, B, I), jnp.float32)

    out = jax.block_until_ready(lstm_one_output_forward(x, params))
    ref_exact = jax.block_until_ready(ref_forward(x, params, mxu_bf16=False))
    ref_bf16 = jax.block_until_ready(ref_forward(x, params, mxu_bf16=True))

    assert out.shape == (O, O), out.shape
    # Tight check vs a reference using the same bf16 MXU operands as the kernel.
    assert jnp.allclose(out, ref_bf16, rtol=2e-2, atol=2e-3), (out, ref_bf16)
    # Looser check vs the exact f32 PyTorch-equivalent reference (bf16 matmul error).
    assert jnp.allclose(out, ref_exact, rtol=5e-2, atol=1e-2), (out, ref_exact)
    print("KERNEL_OK")
</pallas_src>

<mosaic_0001>
module attributes {stable_mosaic.version = 11 : i64} {
  func.func @fused_lstm_attn_kernel(%arg0: i32, %arg1: memref<64x8xbf16, #tpu.memory_space<vmem>>, %arg2: memref<8x128xbf16, #tpu.memory_space<vmem>>, %arg3: memref<32x128xbf16, #tpu.memory_space<vmem>>, %arg4: memref<1x128xf32, #tpu.memory_space<vmem>>, %arg5: memref<32x2xbf16, #tpu.memory_space<vmem>>, %arg6: memref<1x2xf32, #tpu.memory_space<vmem>>, %arg7: memref<64x1xf32, #tpu.memory_space<vmem>>, %arg8: memref<8x128xf32, #tpu.memory_space<vmem>>, %arg9: memref<64x32xf32, #tpu.memory_space<vmem>>) attributes {dimension_semantics = [#tpu.dimension_semantics<arbitrary>], iteration_bounds = array<i64: 1>, scalar_prefetch = 0 : i64, scratch_operands = 1 : i64, tpu.core_type = #tpu.core_type<tc>, window_params = [{pipeline_mode = #tpu.pipeline_mode<synchronous>, transform_indices = @transform_0, window_bounds = array<i64: 64, 8>}, {pipeline_mode = #tpu.pipeline_mode<synchronous>, transform_indices = @transform_1, window_bounds = array<i64: 8, 128>}, {pipeline_mode = #tpu.pipeline_mode<synchronous>, transform_indices = @transform_2, window_bounds = array<i64: 32, 128>}, {pipeline_mode = #tpu.pipeline_mode<synchronous>, transform_indices = @transform_3, window_bounds = array<i64: 1, 128>}, {pipeline_mode = #tpu.pipeline_mode<synchronous>, transform_indices = @transform_4, window_bounds = array<i64: 32, 2>}, {pipeline_mode = #tpu.pipeline_mode<synchronous>, transform_indices = @transform_5, window_bounds = array<i64: 1, 2>}, {pipeline_mode = #tpu.pipeline_mode<synchronous>, transform_indices = @transform_6, window_bounds = array<i64: 64, 1>}, {pipeline_mode = #tpu.pipeline_mode<synchronous>, transform_indices = @transform_7, window_bounds = array<i64: 8, 128>}]} {
    %c0 = arith.constant 0 : index
    %c0_0 = arith.constant 0 : index
    %0 = vector.load %arg1[%c0, %c0_0] : memref<64x8xbf16, #tpu.memory_space<vmem>>, vector<64x8xbf16>
    %c0_1 = arith.constant 0 : index
    %c0_2 = arith.constant 0 : index
    %1 = vector.load %arg2[%c0_1, %c0_2] : memref<8x128xbf16, #tpu.memory_space<vmem>>, vector<8x128xbf16>
    %cst = arith.constant dense<0.000000e+00> : vector<64x128xf32>
    %2 = tpu.matmul %0, %1, %cst {dimension_numbers = #tpu.dot_dimension_numbers<[1], [0], [0], [1], [0, 0, 1, 1], [], []>} : vector<64x8xbf16>, vector<8x128xbf16>, vector<64x128xf32> -> vector<64x128xf32>
    %c0_3 = arith.constant 0 : index
    %c0_4 = arith.constant 0 : index
    %3 = vector.load %arg4[%c0_3, %c0_4] : memref<1x128xf32, #tpu.memory_space<vmem>>, vector<1x128xf32>
    %4 = vector.broadcast %3 : vector<1x128xf32> to vector<64x128xf32>
    %5 = arith.addf %2, %4 : vector<64x128xf32>
    %c0_5 = arith.constant 0 : index
    %c0_6 = arith.constant 0 : index
    %6 = vector.load %arg3[%c0_5, %c0_6] : memref<32x128xbf16, #tpu.memory_space<vmem>>, vector<32x128xbf16>
    %7 = tpu.iota {dimensions = array<i32: 1>} : vector<8x128xi32>
    %c64_i32 = arith.constant 64 : i32
    %8 = vector.broadcast %c64_i32 : i32 to vector<8x128xi32>
    %9 = arith.cmpi sge, %7, %8 : vector<8x128xi32>
    %c96_i32 = arith.constant 96 : i32
    %10 = vector.broadcast %c96_i32 : i32 to vector<8x128xi32>
    %11 = arith.cmpi slt, %7, %10 : vector<8x128xi32>
    %12 = arith.andi %9, %11 : vector<8x128xi1>
    %cst_7 = arith.constant 2.000000e+00 : f32
    %cst_8 = arith.constant 1.000000e+00 : f32
    %13 = vector.broadcast %cst_7 : f32 to vector<8x128xf32>
    %14 = vector.broadcast %cst_8 : f32 to vector<8x128xf32>
    %15 = arith.select %12, %13, %14 : vector<8x128xi1>, vector<8x128xf32>
    %cst_9 = arith.constant -1.000000e+00 : f32
    %cst_10 = arith.constant 0.000000e+00 : f32
    %16 = vector.broadcast %cst_9 : f32 to vector<8x128xf32>
    %17 = vector.broadcast %cst_10 : f32 to vector<8x128xf32>
    %18 = arith.select %12, %16, %17 : vector<8x128xi1>, vector<8x128xf32>
    %cst_11 = arith.constant 0.000000e+00 : f32
    %19 = vector.broadcast %cst_11 : f32 to vector<8x32xf32>
    %cst_12 = arith.constant 0.000000e+00 : f32
    %20 = vector.broadcast %cst_12 : f32 to vector<8x32xf32>
    %21 = vector.extract_strided_slice %5 {offsets = [0, 0], sizes = [8, 128], strides = [1, 1]} : vector<64x128xf32> to vector<8x128xf32>
    %22 = arith.truncf %19 : vector<8x32xf32> to vector<8x32xbf16>
    %cst_13 = arith.constant dense<0.000000e+00> : vector<8x128xf32>
    %23 = tpu.matmul %22, %6, %cst_13 {dimension_numbers = #tpu.dot_dimension_numbers<[1], [0], [0], [1], [0, 0, 1, 1], [], []>} : vector<8x32xbf16>, vector<32x128xbf16>, vector<8x128xf32> -> vector<8x128xf32>
    %24 = arith.addf %21, %23 : vector<8x128xf32>
    %25 = arith.negf %24 : vector<8x128xf32>
    %26 = math.exp %25 : vector<8x128xf32>
    %cst_14 = arith.constant 1.000000e+00 : f32
    %27 = vector.broadcast %cst_14 : f32 to vector<8x128xf32>
    %28 = arith.addf %27, %26 : vector<8x128xf32>
    %29 = arith.divf %27, %28 : vector<8x128xf32>
    %30 = arith.mulf %29, %15 : vector<8x128xf32>
    %31 = arith.addf %30, %18 : vector<8x128xf32>
    %32 = vector.extract_strided_slice %31 {offsets = [0, 0], sizes = [8, 32], strides = [1, 1]} : vector<8x128xf32> to vector<8x32xf32>
    %33 = vector.extract_strided_slice %31 {offsets = [0, 32], sizes = [8, 32], strides = [1, 1]} : vector<8x128xf32> to vector<8x32xf32>
    %34 = vector.extract_strided_slice %31 {offsets = [0, 64], sizes = [8, 32], strides = [1, 1]} : vector<8x128xf32> to vector<8x32xf32>
    %35 = vector.extract_strided_slice %31 {offsets = [0, 96], sizes = [8, 32], strides = [1, 1]} : vector<8x128xf32> to vector<8x32xf32>
    %36 = arith.mulf %33, %20 : vector<8x32xf32>
    %37 = arith.mulf %32, %34 : vector<8x32xf32>
    %38 = arith.addf %36, %37 : vector<8x32xf32>
    %39 = math.tanh %38 : vector<8x32xf32>
    %40 = arith.mulf %35, %39 : vector<8x32xf32>
    %cst_15 = arith.constant 0.000000e+00 : f32
    %41 = vector.broadcast %cst_15 : f32 to vector<8x32xf32>
    %42 = arith.maximumf %40, %41 : vector<8x32xf32>
    %c0_16 = arith.constant 0 : index
    %c0_17 = arith.constant 0 : index
    %43 = vector.load %arg9[%c0_16, %c0_17] : memref<64x32xf32, #tpu.memory_space<vmem>>, vector<8x32xf32>
    tpu.vector_store %arg9[%c0_16, %c0_17], %42 {strides = array<i32>} : memref<64x32xf32, #tpu.memory_space<vmem>>, vector<8x32xf32>,
    %44 = vector.extract_strided_slice %5 {offsets = [8, 0], sizes = [8, 128], strides = [1, 1]} : vector<64x128xf32> to vector<8x128xf32>
    %45 = arith.truncf %40 : vector<8x32xf32> to vector<8x32xbf16>
    %cst_18 = arith.constant dense<0.000000e+00> : vector<8x128xf32>
    %46 = tpu.matmul %45, %6, %cst_18 {dimension_numbers = #tpu.dot_dimension_numbers<[1], [0], [0], [1], [0, 0, 1, 1], [], []>} : vector<8x32xbf16>, vector<32x128xbf16>, vector<8x128xf32> -> vector<8x128xf32>
    %47 = arith.addf %44, %46 : vector<8x128xf32>
    %48 = arith.negf %47 : vector<8x128xf32>
    %49 = math.exp %48 : vector<8x128xf32>
    %cst_19 = arith.constant 1.000000e+00 : f32
    %50 = vector.broadcast %cst_19 : f32 to vector<8x128xf32>
    %51 = arith.addf %50, %49 : vector<8x128xf32>
    %52 = arith.divf %50, %51 : vector<8x128xf32>
    %53 = arith.mulf %52, %15 : vector<8x128xf32>
    %54 = arith.addf %53, %18 : vector<8x128xf32>
    %55 = vector.extract_strided_slice %54 {offsets = [0, 0], sizes = [8, 32], strides = [1, 1]} : vector<8x128xf32> to vector<8x32xf32>
    %56 = vector.extract_strided_slice %54 {offsets = [0, 32], sizes = [8, 32], strides = [1, 1]} : vector<8x128xf32> to vector<8x32xf32>
    %57 = vector.extract_strided_slice %54 {offsets = [0, 64], sizes = [8, 32], strides = [1, 1]} : vector<8x128xf32> to vector<8x32xf32>
    %58 = vector.extract_strided_slice %54 {offsets = [0, 96], sizes = [8, 32], strides = [1, 1]} : vector<8x128xf32> to vector<8x32xf32>
    %59 = arith.mulf %56, %38 : vector<8x32xf32>
    %60 = arith.mulf %55, %57 : vector<8x32xf32>
    %61 = arith.addf %59, %60 : vector<8x32xf32>
    %62 = math.tanh %61 : vector<8x32xf32>
    %63 = arith.mulf %58, %62 : vector<8x32xf32>
    %cst_20 = arith.constant 0.000000e+00 : f32
    %64 = vector.broadcast %cst_20 : f32 to vector<8x32xf32>
    %65 = arith.maximumf %63, %64 : vector<8x32xf32>
    %c8 = arith.constant 8 : index
    %c0_21 = arith.constant 0 : index
    %66 = vector.load %arg9[%c8, %c0_21] : memref<64x32xf32, #tpu.memory_space<vmem>>, vector<8x32xf32>
    tpu.vector_store %arg9[%c8, %c0_21], %65 {strides = array<i32>} : memref<64x32xf32, #tpu.memory_space<vmem>>, vector<8x32xf32>,
    %67 = vector.extract_strided_slice %5 {offsets = [16, 0], sizes = [8, 128], strides = [1, 1]} : vector<64x128xf32> to vector<8x128xf32>
    %68 = arith.truncf %63 : vector<8x32xf32> to vector<8x32xbf16>
    %cst_22 = arith.constant dense<0.000000e+00> : vector<8x128xf32>
    %69 = tpu.matmul %68, %6, %cst_22 {dimension_numbers = #tpu.dot_dimension_numbers<[1], [0], [0], [1], [0, 0, 1, 1], [], []>} : vector<8x32xbf16>, vector<32x128xbf16>, vector<8x128xf32> -> vector<8x128xf32>
    %70 = arith.addf %67, %69 : vector<8x128xf32>
    %71 = arith.negf %70 : vector<8x128xf32>
    %72 = math.exp %71 : vector<8x128xf32>
    %cst_23 = arith.constant 1.000000e+00 : f32
    %73 = vector.broadcast %cst_23 : f32 to vector<8x128xf32>
    %74 = arith.addf %73, %72 : vector<8x128xf32>
    %75 = arith.divf %73, %74 : vector<8x128xf32>
    %76 = arith.mulf %75, %15 : vector<8x128xf32>
    %77 = arith.addf %76, %18 : vector<8x128xf32>
    %78 = vector.extract_strided_slice %77 {offsets = [0, 0], sizes = [8, 32], strides = [1, 1]} : vector<8x128xf32> to vector<8x32xf32>
    %79 = vector.extract_strided_slice %77 {offsets = [0, 32], sizes = [8, 32], strides = [1, 1]} : vector<8x128xf32> to vector<8x32xf32>
    %80 = vector.extract_strided_slice %77 {offsets = [0, 64], sizes = [8, 32], strides = [1, 1]} : vector<8x128xf32> to vector<8x32xf32>
    %81 = vector.extract_strided_slice %77 {offsets = [0, 96], sizes = [8, 32], strides = [1, 1]} : vector<8x128xf32> to vector<8x32xf32>
    %82 = arith.mulf %79, %61 : vector<8x32xf32>
    %83 = arith.mulf %78, %80 : vector<8x32xf32>
    %84 = arith.addf %82, %83 : vector<8x32xf32>
    %85 = math.tanh %84 : vector<8x32xf32>
    %86 = arith.mulf %81, %85 : vector<8x32xf32>
    %cst_24 = arith.constant 0.000000e+00 : f32
    %87 = vector.broadcast %cst_24 : f32 to vector<8x32xf32>
    %88 = arith.maximumf %86, %87 : vector<8x32xf32>
    %c16 = arith.constant 16 : index
    %c0_25 = arith.constant 0 : index
    %89 = vector.load %arg9[%c16, %c0_25] : memref<64x32xf32, #tpu.memory_space<vmem>>, vector<8x32xf32>
    tpu.vector_store %arg9[%c16, %c0_25], %88 {strides = array<i32>} : memref<64x32xf32, #tpu.memory_space<vmem>>, vector<8x32xf32>,
    %90 = vector.extract_strided_slice %5 {offsets = [24, 0], sizes = [8, 128], strides = [1, 1]} : vector<64x128xf32> to vector<8x128xf32>
    %91 = arith.truncf %86 : vector<8x32xf32> to vector<8x32xbf16>
    %cst_26 = arith.constant dense<0.000000e+00> : vector<8x128xf32>
    %92 = tpu.matmul %91, %6, %cst_26 {dimension_numbers = #tpu.dot_dimension_numbers<[1], [0], [0], [1], [0, 0, 1, 1], [], []>} : vector<8x32xbf16>, vector<32x128xbf16>, vector<8x128xf32> -> vector<8x128xf32>
    %93 = arith.addf %90, %92 : vector<8x128xf32>
    %94 = arith.negf %93 : vector<8x128xf32>
    %95 = math.exp %94 : vector<8x128xf32>
    %cst_27 = arith.constant 1.000000e+00 : f32
    %96 = vector.broadcast %cst_27 : f32 to vector<8x128xf32>
    %97 = arith.addf %96, %95 : vector<8x128xf32>
    %98 = arith.divf %96, %97 : vector<8x128xf32>
    %99 = arith.mulf %98, %15 : vector<8x128xf32>
    %100 = arith.addf %99, %18 : vector<8x128xf32>
    %101 = vector.extract_strided_slice %100 {offsets = [0, 0], sizes = [8, 32], strides = [1, 1]} : vector<8x128xf32> to vector<8x32xf32>
    %102 = vector.extract_strided_slice %100 {offsets = [0, 32], sizes = [8, 32], strides = [1, 1]} : vector<8x128xf32> to vector<8x32xf32>
    %103 = vector.extract_strided_slice %100 {offsets = [0, 64], sizes = [8, 32], strides = [1, 1]} : vector<8x128xf32> to vector<8x32xf32>
    %104 = vector.extract_strided_slice %100 {offsets = [0, 96], sizes = [8, 32], strides = [1, 1]} : vector<8x128xf32> to vector<8x32xf32>
    %105 = arith.mulf %102, %84 : vector<8x32xf32>
    %106 = arith.mulf %101, %103 : vector<8x32xf32>
    %107 = arith.addf %105, %106 : vector<8x32xf32>
    %108 = math.tanh %107 : vector<8x32xf32>
    %109 = arith.mulf %104, %108 : vector<8x32xf32>
    %cst_28 = arith.constant 0.000000e+00 : f32
    %110 = vector.broadcast %cst_28 : f32 to vector<8x32xf32>
    %111 = arith.maximumf %109, %110 : vector<8x32xf32>
    %c24 = arith.constant 24 : index
    %c0_29 = arith.constant 0 : index
    %112 = vector.load %arg9[%c24, %c0_29] : memref<64x32xf32, #tpu.memory_space<vmem>>, vector<8x32xf32>
    tpu.vector_store %arg9[%c24, %c0_29], %111 {strides = array<i32>} : memref<64x32xf32, #tpu.memory_space<vmem>>, vector<8x32xf32>,
    %113 = vector.extract_strided_slice %5 {offsets = [32, 0], sizes = [8, 128], strides = [1, 1]} : vector<64x128xf32> to vector<8x128xf32>
    %114 = arith.truncf %109 : vector<8x32xf32> to vector<8x32xbf16>
    %cst_30 = arith.constant dense<0.000000e+00> : vector<8x128xf32>
    %115 = tpu.matmul %114, %6, %cst_30 {dimension_numbers = #tpu.dot_dimension_numbers<[1], [0], [0], [1], [0, 0, 1, 1], [], []>} : vector<8x32xbf16>, vector<32x128xbf16>, vector<8x128xf32> -> vector<8x128xf32>
    %116 = arith.addf %113, %115 : vector<8x128xf32>
    %117 = arith.negf %116 : vector<8x128xf32>
    %118 = math.exp %117 : vector<8x128xf32>
    %cst_31 = arith.constant 1.000000e+00 : f32
    %119 = vector.broadcast %cst_31 : f32 to vector<8x128xf32>
    %120 = arith.addf %119, %118 : vector<8x128xf32>
    %121 = arith.divf %119, %120 : vector<8x128xf32>
    %122 = arith.mulf %121, %15 : vector<8x128xf32>
    %123 = arith.addf %122, %18 : vector<8x128xf32>
    %124 = vector.extract_strided_slice %123 {offsets = [0, 0], sizes = [8, 32], strides = [1, 1]} : vector<8x128xf32> to vector<8x32xf32>
    %125 = vector.extract_strided_slice %123 {offsets = [0, 32], sizes = [8, 32], strides = [1, 1]} : vector<8x128xf32> to vector<8x32xf32>
    %126 = vector.extract_strided_slice %123 {offsets = [0, 64], sizes = [8, 32], strides = [1, 1]} : vector<8x128xf32> to vector<8x32xf32>
    %127 = vector.extract_strided_slice %123 {offsets = [0, 96], sizes = [8, 32], strides = [1, 1]} : vector<8x128xf32> to vector<8x32xf32>
    %128 = arith.mulf %125, %107 : vector<8x32xf32>
    %129 = arith.mulf %124, %126 : vector<8x32xf32>
    %130 = arith.addf %128, %129 : vector<8x32xf32>
    %131 = math.tanh %130 : vector<8x32xf32>
    %132 = arith.mulf %127, %131 : vector<8x32xf32>
    %cst_32 = arith.constant 0.000000e+00 : f32
    %133 = vector.broadcast %cst_32 : f32 to vector<8x32xf32>
    %134 = arith.maximumf %132, %133 : vector<8x32xf32>
    %c32 = arith.constant 32 : index
    %c0_33 = arith.constant 0 : index
    %135 = vector.load %arg9[%c32, %c0_33] : memref<64x32xf32, #tpu.memory_space<vmem>>, vector<8x32xf32>
    tpu.vector_store %arg9[%c32, %c0_33], %134 {strides = array<i32>} : memref<64x32xf32, #tpu.memory_space<vmem>>, vector<8x32xf32>,
    %136 = vector.extract_strided_slice %5 {offsets = [40, 0], sizes = [8, 128], strides = [1, 1]} : vector<64x128xf32> to vector<8x128xf32>
    %137 = arith.truncf %132 : vector<8x32xf32> to vector<8x32xbf16>
    %cst_34 = arith.constant dense<0.000000e+00> : vector<8x128xf32>
    %138 = tpu.matmul %137, %6, %cst_34 {dimension_numbers = #tpu.dot_dimension_numbers<[1], [0], [0], [1], [0, 0, 1, 1], [], []>} : vector<8x32xbf16>, vector<32x128xbf16>, vector<8x128xf32> -> vector<8x128xf32>
    %139 = arith.addf %136, %138 : vector<8x128xf32>
    %140 = arith.negf %139 : vector<8x128xf32>
    %141 = math.exp %140 : vector<8x128xf32>
    %cst_35 = arith.constant 1.000000e+00 : f32
    %142 = vector.broadcast %cst_35 : f32 to vector<8x128xf32>
    %143 = arith.addf %142, %141 : vector<8x128xf32>
    %144 = arith.divf %142, %143 : vector<8x128xf32>
    %145 = arith.mulf %144, %15 : vector<8x128xf32>
    %146 = arith.addf %145, %18 : vector<8x128xf32>
    %147 = vector.extract_strided_slice %146 {offsets = [0, 0], sizes = [8, 32], strides = [1, 1]} : vector<8x128xf32> to vector<8x32xf32>
    %148 = vector.extract_strided_slice %146 {offsets = [0, 32], sizes = [8, 32], strides = [1, 1]} : vector<8x128xf32> to vector<8x32xf32>
    %149 = vector.extract_strided_slice %146 {offsets = [0, 64], sizes = [8, 32], strides = [1, 1]} : vector<8x128xf32> to vector<8x32xf32>
    %150 = vector.extract_strided_slice %146 {offsets = [0, 96], sizes = [8, 32], strides = [1, 1]} : vector<8x128xf32> to vector<8x32xf32>
    %151 = arith.mulf %148, %130 : vector<8x32xf32>
    %152 = arith.mulf %147, %149 : vector<8x32xf32>
    %153 = arith.addf %151, %152 : vector<8x32xf32>
    %154 = math.tanh %153 : vector<8x32xf32>
    %155 = arith.mulf %150, %154 : vector<8x32xf32>
    %cst_36 = arith.constant 0.000000e+00 : f32
    %156 = vector.broadcast %cst_36 : f32 to vector<8x32xf32>
    %157 = arith.maximumf %155, %156 : vector<8x32xf32>
    %c40 = arith.constant 40 : index
    %c0_37 = arith.constant 0 : index
    %158 = vector.load %arg9[%c40, %c0_37] : memref<64x32xf32, #tpu.memory_space<vmem>>, vector<8x32xf32>
    tpu.vector_store %arg9[%c40, %c0_37], %157 {strides = array<i32>} : memref<64x32xf32, #tpu.memory_space<vmem>>, vector<8x32xf32>,
    %159 = vector.extract_strided_slice %5 {offsets = [48, 0], sizes = [8, 128], strides = [1, 1]} : vector<64x128xf32> to vector<8x128xf32>
    %160 = arith.truncf %155 : vector<8x32xf32> to vector<8x32xbf16>
    %cst_38 = arith.constant dense<0.000000e+00> : vector<8x128xf32>
    %161 = tpu.matmul %160, %6, %cst_38 {dimension_numbers = #tpu.dot_dimension_numbers<[1], [0], [0], [1], [0, 0, 1, 1], [], []>} : vector<8x32xbf16>, vector<32x128xbf16>, vector<8x128xf32> -> vector<8x128xf32>
    %162 = arith.addf %159, %161 : vector<8x128xf32>
    %163 = arith.negf %162 : vector<8x128xf32>
    %164 = math.exp %163 : vector<8x128xf32>
    %cst_39 = arith.constant 1.000000e+00 : f32
    %165 = vector.broadcast %cst_39 : f32 to vector<8x128xf32>
    %166 = arith.addf %165, %164 : vector<8x128xf32>
    %167 = arith.divf %165, %166 : vector<8x128xf32>
    %168 = arith.mulf %167, %15 : vector<8x128xf32>
    %169 = arith.addf %168, %18 : vector<8x128xf32>
    %170 = vector.extract_strided_slice %169 {offsets = [0, 0], sizes = [8, 32], strides = [1, 1]} : vector<8x128xf32> to vector<8x32xf32>
    %171 = vector.extract_strided_slice %169 {offsets = [0, 32], sizes = [8, 32], strides = [1, 1]} : vector<8x128xf32> to vector<8x32xf32>
    %172 = vector.extract_strided_slice %169 {offsets = [0, 64], sizes = [8, 32], strides = [1, 1]} : vector<8x128xf32> to vector<8x32xf32>
    %173 = vector.extract_strided_slice %169 {offsets = [0, 96], sizes = [8, 32], strides = [1, 1]} : vector<8x128xf32> to vector<8x32xf32>
    %174 = arith.mulf %171, %153 : vector<8x32xf32>
    %175 = arith.mulf %170, %172 : vector<8x32xf32>
    %176 = arith.addf %174, %175 : vector<8x32xf32>
    %177 = math.tanh %176 : vector<8x32xf32>
    %178 = arith.mulf %173, %177 : vector<8x32xf32>
    %cst_40 = arith.constant 0.000000e+00 : f32
    %179 = vector.broadcast %cst_40 : f32 to vector<8x32xf32>
    %180 = arith.maximumf %178, %179 : vector<8x32xf32>
    %c48 = arith.constant 48 : index
    %c0_41 = arith.constant 0 : index
    %181 = vector.load %arg9[%c48, %c0_41] : memref<64x32xf32, #tpu.memory_space<vmem>>, vector<8x32xf32>
    tpu.vector_store %arg9[%c48, %c0_41], %180 {strides = array<i32>} : memref<64x32xf32, #tpu.memory_space<vmem>>, vector<8x32xf32>,
    %182 = vector.extract_strided_slice %5 {offsets = [56, 0], sizes = [8, 128], strides = [1, 1]} : vector<64x128xf32> to vector<8x128xf32>
    %183 = arith.truncf %178 : vector<8x32xf32> to vector<8x32xbf16>
    %cst_42 = arith.constant dense<0.000000e+00> : vector<8x128xf32>
    %184 = tpu.matmul %183, %6, %cst_42 {dimension_numbers = #tpu.dot_dimension_numbers<[1], [0], [0], [1], [0, 0, 1, 1], [], []>} : vector<8x32xbf16>, vector<32x128xbf16>, vector<8x128xf32> -> vector<8x128xf32>
    %185 = arith.addf %182, %184 : vector<8x128xf32>
    %186 = arith.negf %185 : vector<8x128xf32>
    %187 = math.exp %186 : vector<8x128xf32>
    %cst_43 = arith.constant 1.000000e+00 : f32
    %188 = vector.broadcast %cst_43 : f32 to vector<8x128xf32>
    %189 = arith.addf %188, %187 : vector<8x128xf32>
    %190 = arith.divf %188, %189 : vector<8x128xf32>
    %191 = arith.mulf %190, %15 : vector<8x128xf32>
    %192 = arith.addf %191, %18 : vector<8x128xf32>
    %193 = vector.extract_strided_slice %192 {offsets = [0, 0], sizes = [8, 32], strides = [1, 1]} : vector<8x128xf32> to vector<8x32xf32>
    %194 = vector.extract_strided_slice %192 {offsets = [0, 32], sizes = [8, 32], strides = [1, 1]} : vector<8x128xf32> to vector<8x32xf32>
    %195 = vector.extract_strided_slice %192 {offsets = [0, 64], sizes = [8, 32], strides = [1, 1]} : vector<8x128xf32> to vector<8x32xf32>
    %196 = vector.extract_strided_slice %192 {offsets = [0, 96], sizes = [8, 32], strides = [1, 1]} : vector<8x128xf32> to vector<8x32xf32>
    %197 = arith.mulf %194, %176 : vector<8x32xf32>
    %198 = arith.mulf %193, %195 : vector<8x32xf32>
    %199 = arith.addf %197, %198 : vector<8x32xf32>
    %200 = math.tanh %199 : vector<8x32xf32>
    %201 = arith.mulf %196, %200 : vector<8x32xf32>
    %cst_44 = arith.constant 0.000000e+00 : f32
    %202 = vector.broadcast %cst_44 : f32 to vector<8x32xf32>
    %203 = arith.maximumf %201, %202 : vector<8x32xf32>
    %c56 = arith.constant 56 : index
    %c0_45 = arith.constant 0 : index
    %204 = vector.load %arg9[%c56, %c0_45] : memref<64x32xf32, #tpu.memory_space<vmem>>, vector<8x32xf32>
    tpu.vector_store %arg9[%c56, %c0_45], %203 {strides = array<i32>} : memref<64x32xf32, #tpu.memory_space<vmem>>, vector<8x32xf32>,
    %c0_46 = arith.constant 0 : index
    %c0_47 = arith.constant 0 : index
    %205 = vector.load %arg9[%c0_46, %c0_47] : memref<64x32xf32, #tpu.memory_space<vmem>>, vector<64x32xf32>
    %206 = arith.truncf %205 : vector<64x32xf32> to vector<64x32xbf16>
    %c0_48 = arith.constant 0 : index
    %c0_49 = arith.constant 0 : index
    %207 = vector.load %arg5[%c0_48, %c0_49] : memref<32x2xbf16, #tpu.memory_space<vmem>>, vector<32x2xbf16>
    %cst_50 = arith.constant dense<0.000000e+00> : vector<64x2xf32>
    %208 = tpu.matmul %206, %207, %cst_50 {dimension_numbers = #tpu.dot_dimension_numbers<[1], [0], [0], [1], [0, 0, 1, 1], [], []>} : vector<64x32xbf16>, vector<32x2xbf16>, vector<64x2xf32> -> vector<64x2xf32>
    %c0_51 = arith.constant 0 : index
    %c0_52 = arith.constant 0 : index
    %209 = vector.load %arg6[%c0_51, %c0_52] : memref<1x2xf32, #tpu.memory_space<vmem>>, vector<1x2xf32>
    %210 = vector.broadcast %209 : vector<1x2xf32> to vector<64x2xf32>
    %211 = arith.addf %208, %210 : vector<64x2xf32>
    %212 = vector.extract_strided_slice %211 {offsets = [0, 0], sizes = [64, 1], strides = [1, 1]} : vector<64x2xf32> to vector<64x1xf32>
    %213 = vector.extract_strided_slice %211 {offsets = [0, 1], sizes = [64, 1], strides = [1, 1]} : vector<64x2xf32> to vector<64x1xf32>
    %c0_53 = arith.constant 0 : index
    %c0_54 = arith.constant 0 : index
    %214 = vector.load %arg7[%c0_53, %c0_54] : memref<64x1xf32, #tpu.memory_space<vmem>>, vector<64x1xf32>
    %215 = arith.addf %213, %214 : vector<64x1xf32>
    %cst_55 = arith.constant dense<0xFF800000> : vector<1xf32>
    %216 = vector.multi_reduction <maximumf>, %215, %cst_55 [0] : vector<64x1xf32> to vector<1xf32>
    %217 = vector.shape_cast %216 : vector<1xf32> to vector<1x1xf32>
    %218 = vector.broadcast %217 : vector<1x1xf32> to vector<64x1xf32>
    %219 = arith.subf %215, %218 : vector<64x1xf32>
    %220 = math.exp %219 : vector<64x1xf32>
    %cst_56 = arith.constant dense<0.000000e+00> : vector<1xf32>
    %221 = vector.multi_reduction <add>, %220, %cst_56 [0] : vector<64x1xf32> to vector<1xf32>
    %222 = vector.shape_cast %221 : vector<1xf32> to vector<1x1xf32>
    %223 = vector.broadcast %222 : vector<1x1xf32> to vector<64x1xf32>
    %224 = arith.divf %220, %223 : vector<64x1xf32>
    %225 = arith.mulf %224, %212 : vector<64x1xf32>
    %cst_57 = arith.constant dense<0.000000e+00> : vector<1xf32>
    %226 = vector.multi_reduction <add>, %225, %cst_57 [0] : vector<64x1xf32> to vector<1xf32>
    %227 = vector.shape_cast %226 : vector<1xf32> to vector<1x1xf32>
    %228 = vector.shape_cast %227 : vector<1x1xf32> to vector<1x1xf32>
    %229 = vector.broadcast %228 : vector<1x1xf32> to vector<8x128xf32>
    %c0_58 = arith.constant 0 : index
    %c0_59 = arith.constant 0 : index
    %230 = vector.load %arg8[%c0_58, %c0_59] : memref<8x128xf32, #tpu.memory_space<vmem>>, vector<8x128xf32>
    tpu.vector_store %arg8[%c0_58, %c0_59], %229 {strides = array<i32>} : memref<8x128xf32, #tpu.memory_space<vmem>>, vector<8x128xf32>,
    return
  }
  func.func @transform_0(%arg0: i32) -> (i32, i32) {
    %c0_i32 = arith.constant 0 : i32
    %c0_i32_0 = arith.constant 0 : i32
    %c0_i32_1 = arith.constant 0 : i32
    return %c0_i32, %c0_i32_0 : i32, i32
  }
  func.func @transform_1(%arg0: i32) -> (i32, i32) {
    %c0_i32 = arith.constant 0 : i32
    %c0_i32_0 = arith.constant 0 : i32
    %c0_i32_1 = arith.constant 0 : i32
    return %c0_i32, %c0_i32_0 : i32, i32
  }
  func.func @transform_2(%arg0: i32) -> (i32, i32) {
    %c0_i32 = arith.constant 0 : i32
    %c0_i32_0 = arith.constant 0 : i32
    %c0_i32_1 = arith.constant 0 : i32
    return %c0_i32, %c0_i32_0 : i32, i32
  }
  func.func @transform_3(%arg0: i32) -> (i32, i32) {
    %c0_i32 = arith.constant 0 : i32
    %c0_i32_0 = arith.constant 0 : i32
    %c0_i32_1 = arith.constant 0 : i32
    return %c0_i32, %c0_i32_0 : i32, i32
  }
  func.func @transform_4(%arg0: i32) -> (i32, i32) {
    %c0_i32 = arith.constant 0 : i32
    %c0_i32_0 = arith.constant 0 : i32
    %c0_i32_1 = arith.constant 0 : i32
    return %c0_i32, %c0_i32_0 : i32, i32
  }
  func.func @transform_5(%arg0: i32) -> (i32, i32) {
    %c0_i32 = arith.constant 0 : i32
    %c0_i32_0 = arith.constant 0 : i32
    %c0_i32_1 = arith.constant 0 : i32
    return %c0_i32, %c0_i32_0 : i32, i32
  }
  func.func @transform_6(%arg0: i32) -> (i32, i32) {
    %c0_i32 = arith.constant 0 : i32
    %c0_i32_0 = arith.constant 0 : i32
    %c0_i32_1 = arith.constant 0 : i32
    return %c0_i32, %c0_i32_0 : i32, i32
  }
  func.func @transform_7(%arg0: i32) -> (i32, i32) {
    %c0_i32 = arith.constant 0 : i32
    %c0_i32_0 = arith.constant 0 : i32
    %c0_i32_1 = arith.constant 0 : i32
    return %c0_i32, %c0_i32_0 : i32, i32
  }
}

</mosaic_0001>

<bundles_post_ra>
// kernel: tile.8
= control target key start
LH: loop header
LB: loop body
LE: loop exit
PB: predicated region body
PF: predicated region fallthrough
CT: control target
= control target key end

     0   :  { %s22_s0 = inlined_call_operand.vmem [shape: f32[8], index: 0, kind: input, shape index: {}]   ;;  %s23_s1 = inlined_call_operand.vmem [shape: f32[8,8], index: 1, kind: output, shape index: {}]  }
   0x1   :  { %v4_v0 = vld [vmem:[%s22_s0] ss:$0 sm:$0xff] }
   0x2   :  { %5 = vst [vmem:[%s23_s1] sm:$0xff] %v4_v0 }

// kernel: tile.0
= control target key start
LH: loop header
LB: loop body
LE: loop exit
PB: predicated region body
PF: predicated region fallthrough
CT: control target
= control target key end

     0   :  { %vm3_vm0 = vcmask 7168   ;;  %s84_s8 = smov 125   ;;  %s85_s13 = smov 126   ;;  %s167_s0 = inlined_call_operand.vmem [shape: f32[8,8], index: 0, kind: input, shape index: {}]   ;;  %s168_s1 = inlined_call_operand.vmem [shape: f32[64,1], index: 1, kind: output, shape index: {}]  }
   0x1   :  { %v6_v0 = vld [vmem:[%s167_s0] sm:$0xff]   ;;  %s83_s0 = smov 127   ;;  %s86_s14 = smov 124  }
   0x2   :  { %7 = vrot.lane.b32.xlu0 %v6_v0, %s83_s0  ;;  %23 = vrot.lane.b32.xlu1 %v6_v0, %s84_s8  ;;  %4 = vst.msk [vmem:[%s168_s1] ss:$8 sm:$0xf] %vm3_vm0, %v6_v0   ;;  %5 = vst.msk [vmem:[%s168_s1] ss:$8 sm:$0xf0] %vm3_vm0, %v6_v0  }
   0x3   :  { %s87_s15 = smov 123   ;;  %s88_s16 = smov 122  }
   0x4   :  { %s89_s17 = smov 121  }
   0x6   :  { %15 = vrot.lane.b32.xlu0 %v6_v0, %s85_s13  ;;  %31 = vrot.lane.b32.xlu1 %v6_v0, %s86_s14 }
   0xa   :  { %39 = vrot.lane.b32.xlu0 %v6_v0, %s87_s15  ;;  %47 = vrot.lane.b32.xlu1 %v6_v0, %s88_s16 }
   0xe   :  { %55 = vrot.lane.b32.xlu0 %v6_v0, %s89_s17 }
  0x74   :  { %v8_v1 = vpop.permute.xlu0 %7   ;;  %v24_v2 = vpop.permute.xlu1 %23  }
  0x75   :  { %62 = vst.msk [vmem:[%s168_s1 + $0x1] ss:$8 sm:$0xf] %vm3_vm0, %v8_v1   ;;  %63 = vst.msk [vmem:[%s168_s1 + $0x1] ss:$8 sm:$0xf0] %vm3_vm0, %v8_v1  }
  0x76   :  { %66 = vst.msk [vmem:[%s168_s1 + $0x3] ss:$8 sm:$0xf] %vm3_vm0, %v24_v2   ;;  %67 = vst.msk [vmem:[%s168_s1 + $0x3] ss:$8 sm:$0xf0] %vm3_vm0, %v24_v2  }
  0x78   :  { %v16_v3 = vpop.permute.xlu0 %15   ;;  %v32_v4 = vpop.permute.xlu1 %31  }
  0x79   :  { %64 = vst.msk [vmem:[%s168_s1 + $0x2] ss:$8 sm:$0xf] %vm3_vm0, %v16_v3   ;;  %65 = vst.msk [vmem:[%s168_s1 + $0x2] ss:$8 sm:$0xf0] %vm3_vm0, %v16_v3  }
  0x7a   :  { %68 = vst.msk [vmem:[%s168_s1 + $0x4] ss:$8 sm:$0xf] %vm3_vm0, %v32_v4   ;;  %69 = vst.msk [vmem:[%s168_s1 + $0x4] ss:$8 sm:$0xf0] %vm3_vm0, %v32_v4  }
  0x7c   :  { %v40_v5 = vpop.permute.xlu0 %39   ;;  %v48_v6 = vpop.permute.xlu1 %47  }
  0x7d   :  { %70 = vst.msk [vmem:[%s168_s1 + $0x5] ss:$8 sm:$0xf] %vm3_vm0, %v40_v5   ;;  %71 = vst.msk [vmem:[%s168_s1 + $0x5] ss:$8 sm:$0xf0] %vm3_vm0, %v40_v5  }
  0x7e   :  { %72 = vst.msk [vmem:[%s168_s1 + $0x6] ss:$8 sm:$0xf] %vm3_vm0, %v48_v6   ;;  %73 = vst.msk [vmem:[%s168_s1 + $0x6] ss:$8 sm:$0xf0] %vm3_vm0, %v48_v6  }
  0x80   :  { %v56_v7 = vpop.permute.xlu0 %55  }
  0x81   :  { %74 = vst.msk [vmem:[%s168_s1 + $0x7] ss:$8 sm:$0xf] %vm3_vm0, %v56_v7   ;;  %75 = vst.msk [vmem:[%s168_s1 + $0x7] ss:$8 sm:$0xf0] %vm3_vm0, %v56_v7  }

// kernel: lstm_one_output_forward.1
= control target key start
LH: loop header
LB: loop body
LE: loop exit
PB: predicated region body
PF: predicated region fallthrough
CT: control target
= control target key end

     0   :  { %vm76_vm0 = vcmask 1043456   ;;  %vm63_vm1 = vcmask 64512   ;;  %v1346_v4 = vmov 0.0   ;;  %vm1347_vm2 = vmmov 0   ;;  %s1351_s14 = smov 32   ;;  %s1677_s1 = inlined_call_operand.vmem [shape: bf16[8,128], index: 1, kind: input, shape index: {}]   ;;  %s1678_s0 = inlined_call_operand.vmem [shape: bf16[64,8], index: 0, kind: input, shape index: {}]   ;;  %s1679_s2 = inlined_call_operand.vmem [shape: bf16[32,128], index: 2, kind: input, shape index: {}]   ;;  %s1680_s3 = inlined_call_operand.vmem [shape: f32[1,128], index: 3, kind: input, shape index: {}]   ;;  %s1681_s4 = inlined_call_operand.vmem [shape: bf16[32,2], index: 4, kind: input, shape index: {}]   ;;  %s1682_s6 = inlined_call_operand.vmem [shape: f32[64,1], index: 6, kind: input, shape index: {}]   ;;  %s1683_s5 = inlined_call_operand.vmem [shape: f32[1,2], index: 5, kind: input, shape index: {}]   ;;  %s1684_s7 = inlined_call_operand.vmem [shape: f32[8,128], index: 7, kind: output, shape index: {}]  }
   0x1   :  { %v35_v0 = vld [vmem:[%s1677_s1] sm:$0xf]  ;;  %v1272_v2 = vld [vmem:[%s1678_s0 + $0x10] sm:$0xff]   ;;  %v1273_v3 = vld [vmem:[%s1678_s0 + $0x18] sm:$0xff]   ;;  %v1348_v9 = vmov 0   ;;  %v149_v33 = vlaneseq  ;;  %v1349_v37 = vmov 1.0  }
   0x2   :  { %1261 = vmatprep.subr.msk.bf16.mxu1 %vm76_vm0, %v35_v0  ;;  %v78_v1 = vsel %vm76_vm0, %v35_v0, 0  ;;  %1260 = vmatprep.subr.msk.bf16.mxu0 %vm76_vm0, %v35_v0  ;;  %v1408_v5 = vld [vmem:[%s1679_s2] sm:$0xff]   ;;  %v1276_v7 = vld [vmem:[%s1678_s0 + $0x8] sm:$0xff]   ;;  %vm168_vm6 = vcmask 261120   ;;  %vm957_vm7 = vcmask 15368  }
   0x3   :  { %1259 = vmatpush3.bf16.msra.mxu1 %v78_v1  ;;  %1173 = vmatpush3.bf16.msra.mxu0 %v78_v1  ;;  %v1275_v6 = vld [vmem:[%s1678_s0] sm:$0xff]   ;;  %v1423_v8 = vld [vmem:[%s1679_s2 + $0x8] sm:$0xff]   ;;  %v150_v36 = vand.u32 127, %v149_v33 }
   0x4   :  { %1178 = vmatprep.mubr.msk.bf16.mxu1 %vm63_vm1, %v1272_v2  ;;  %1182 = vmatprep.subr.bf16.mxu1 %v1346_v4  ;;  %v1104_v10 = vld [vmem:[%s1680_s3] ss:$0 sm:$0xff]  ;;  %s1350_s3 = smov 64  }
   0x5   :  { %1198 = vmatprep.subr.bf16.mxu0 %v1346_v4  ;;  %1174 = vmatprep.mubr.msk.bf16.mxu0 %vm63_vm1, %v1275_v6  ;;  %vm151_vm3 = vcmp.ge.s32.totalorder %v150_v36, 64  ;;  %vm152_vm4 = vcmp.lt.s32.totalorder %v150_v36, 96 }
   0x6   :  { %1179 = vmatmul.mubr.msk.bf16.vlgmr.msra.gmra.mrb[0].mxu1 %vm63_vm1, %v1273_v3  ;;  %1175 = vmatmul.mubr.msk.bf16.vlgmr.msra.gmra.mrb[0].mxu0 %vm63_vm1, %v1276_v7  ;;  %vm153_vm5 = vmand %vm151_vm3, %vm152_vm4 }
   0x7   :  { %1183 = vmatpush3.bf16.msra.mxu1 %v1408_v5  ;;  %1186 = vmatprep.mubr.msk.bf16.mxu1 %vm1347_vm2, %v1346_v4  ;;  %v1458_v38 = vsel %vm153_vm5, 2.0, %v1349_v37  ;;  %v1461_v40 = vsel %vm153_vm5, -1.0, %v1346_v4 }
   0x8   :  { %1184 = vmatprep.subr.bf16.mxu1 %v1346_v4  ;;  %1199 = vmatpush3.bf16.msra.mxu0 %v1408_v5 }
   0x9   :  { %1200 = vmatprep.subr.bf16.mxu0 %v1346_v4  ;;  %1202 = vmatprep.mubr.msk.bf16.mxu0 %vm1347_vm2, %v1346_v4 }
   0xb   :  { %1185 = vmatpush3.bf16.msra.mxu1 %v1423_v8 }
   0xc   :  { %1190 = vmatprep.subr.bf16.mxu1 %v1346_v4  ;;  %1201 = vmatpush3.bf16.msra.mxu0 %v1423_v8 }
   0xd   :  { %1214 = vmatprep.subr.bf16.mxu0 %v1346_v4 }
   0xe   :  { %1187 = vmatmul.mubr.bf16.vlgmr.msra.gmra.mrb[4].mxu1 %v1348_v9 }
   0xf   :  { %1191 = vmatpush3.bf16.msra.mxu1 %v1408_v5  ;;  %1194 = vmatprep.mubr.msk.bf16.mxu1 %vm1347_vm2, %v1346_v4 }
  0x10   :  { %1192 = vmatprep.subr.bf16.mxu1 %v1346_v4 }
  0x13   :  { %1193 = vmatpush3.bf16.msra.mxu1 %v1423_v8 }
  0x14   :  { %1206 = vmatprep.subr.bf16.mxu1 %v1346_v4 }
  0xd9   :  { %v1180_v11 = vpop.f32.mrb[0].mxu1  ;;  %v1176_v16 = vpop.f32.mrb[0].mxu0 }
  0xda   :  { %v1446_v12 = vadd.f32 %v1180_v11, %v1104_v10  ;;  %v130_v13 = vpop.f32.mrb[1].mxu1  ;;  %v1452_v18 = vadd.f32 %v1176_v16, %v1104_v10  ;;  %v114_v20 = vpop.f32.mrb[1].mxu0 }
  0xdb   :  { %v1448_v14 = vadd.f32 %v1104_v10, %v130_v13  ;;  %v1181_v15 = vpop.f32.mrb[2].mxu1  ;;  %v1177_v22 = vpop.f32.mrb[2].mxu0  ;;  %v115_v23 = vadd.f32 %v1104_v10, %v114_v20 }
  0xdc   :  { %v1450_v17 = vadd.f32 %v1181_v15, %v1104_v10  ;;  %v133_v19 = vpop.f32.mrb[3].mxu1  ;;  %v1456_v24 = vadd.f32 %v1177_v22, %v1104_v10  ;;  %v117_v25 = vpop.f32.mrb[3].mxu0 }
  0xdd   :  { %v1454_v21 = vadd.f32 %v1104_v10, %v133_v19  ;;  %v118_v26 = vadd.f32 %v1104_v10, %v117_v25 }
  0xe1   :  { %v206_v27 = vpop.f32.mrb[4].mxu1 }
  0xe2   :  { %v212_v28 = vadd.f32 %v206_v27, %v115_v23  ;;  %v1188_v29 = vpop.f32.mrb[5].mxu1 }
  0xe3   :  { %v209_v30 = vpop.f32.mrb[6].mxu1 }
  0xe4   :  { %v1115_v31 = vmul.f32 -1.442695, %v212_v28  ;;  %v1189_v32 = vpop.f32.mrb[7].mxu1 }
  0xe6   :  { %1280 = vpow2.f32 %v1115_v31 }
  0xf0   :  { %v1281_v34 = vpop.eup %1280 }
  0xf1   :  { %v216_v35 = vadd.f32 1.0, %v1281_v34 }
  0xf3   :  { %1282 = vrcp.f32 %v216_v35 }
  0xfd   :  { %v1283_v39 = vpop.eup %1282 }
  0xfe   :  { %v219_v41 = vmul.f32 %v1283_v39, %v1458_v38 }
 0x100   :  { %v220_v42 = vadd.f32 %v219_v41, %v1461_v40 }
 0x102   :  { %223 = vrot.lane.b32.xlu0 %v220_v42, %s1350_s3  ;;  %v221_v45 = vmul.f32 0.0, %v220_v42 }
 0x174   :  { %v224_v43 = vpop.permute.xlu0 %223 }
 0x175   :  { %v226_v44 = vmul.f32 %v224_v43, %v220_v42 }
 0x177   :  { %228 = vrot.lane.b32.xlu0 %v226_v44, %s1351_s14 }
 0x1e9   :  { %v229_v46 = vpop.permute.xlu0 %228 }
 0x1ea   :  { %v231_v47 = vadd.f32 %v229_v46, %v221_v45 }
 0x1ec   :  { %1284 = vtanh.f32 %v231_v47 }
 0x1f6   :  { %v1285_v48 = vpop.eup %1284 }
 0x1f7   :  { %234 = vrot.lane.b32.xlu1 %v1285_v48, %s1350_s3 }
 0x269   :  { %v235_v49 = vpop.permute.xlu1 %234 }
 0x26a   :  { %v1468_v50 = vmul.f32 %v235_v49, %v220_v42 }
 0x26c   :  { %v244_v51 = vpack.c.bf16 %v1468_v50, %v1468_v50 }
 0x26e   :  { %246 = vrot.lane.b32.xlu1 %v244_v51, %s1351_s14 }
 0x2e0   :  { %v247_v52 = vpop.permute.xlu1 %246 }
 0x2e1   :  { %1195 = vmatmul.mubr.msk.bf16.vlgmr.msra.gmra.mrb[8].mxu1 %vm168_vm6, %v247_v52 }
 0x2e2   :  { %1207 = vmatpush3.bf16.msra.mxu1 %v1408_v5  ;;  %1210 = vmatprep.mubr.msk.bf16.mxu1 %vm1347_vm2, %v1346_v4 }
 0x2e3   :  { %1208 = vmatprep.subr.bf16.mxu1 %v1346_v4 }
 0x2e6   :  { %1209 = vmatpush3.bf16.msra.mxu1 %v1423_v8 }
 0x2e7   :  { %1222 = vmatprep.subr.bf16.mxu1 %v1346_v4 }
 0x3b4   :  { %v285_v53 = vpop.f32.mrb[8].mxu1 }
 0x3b5   :  { %v291_v54 = vadd.f32 %v285_v53, %v118_v26  ;;  %v1196_v55 = vpop.f32.mrb[9].mxu1 }
 0x3b6   :  { %v288_v56 = vpop.f32.mrb[10].mxu1 }
 0x3b7   :  { %v1117_v57 = vmul.f32 -1.442695, %v291_v54  ;;  %v1197_v58 = vpop.f32.mrb[11].mxu1 }
 0x3b9   :  { %1286 = vpow2.f32 %v1117_v57 }
 0x3c3   :  { %v1287_v59 = vpop.eup %1286 }
 0x3c4   :  { %v295_v60 = vadd.f32 1.0, %v1287_v59 }
 0x3c6   :  { %1288 = vrcp.f32 %v295_v60 }
 0x3d0   :  { %v1289_v61 = vpop.eup %1288 }
 0x3d1   :  { %v298_v62 = vmul.f32 %v1289_v61, %v1458_v38 }
 0x3d3   :  { %v299_v63 = vadd.f32 %v298_v62, %v1461_v40 }
 0x3d5   :  { %302 = vrot.lane.b32.xlu0 %v299_v63, %s1350_s3  ;;  %v300_v2 = vmul.f32 %v299_v63, %v231_v47 }
 0x447   :  { %v303_v0 = vpop.permute.xlu0 %302 }
 0x448   :  { %v305_v1 = vmul.f32 %v303_v0, %v299_v63 }
 0x44a   :  { %307 = vrot.lane.b32.xlu1 %v305_v1, %s1351_s14 }
 0x4bc   :  { %v308_v3 = vpop.permute.xlu1 %307 }
 0x4bd   :  { %v310_v6 = vadd.f32 %v308_v3, %v300_v2 }
 0x4bf   :  { %1290 = vtanh.f32 %v310_v6 }
 0x4c9   :  { %v1291_v7 = vpop.eup %1290 }
 0x4ca   :  { %313 = vrot.lane.b32.xlu0 %v1291_v7, %s1350_s3 }
 0x53c   :  { %v314_v9 = vpop.permute.xlu0 %313 }
 0x53d   :  { %v1485_v10 = vmul.f32 %v314_v9, %v299_v63 }
 0x53f   :  { %v323_v11 = vpack.c.bf16 %v1485_v10, %v1485_v10 }
 0x541   :  { %325 = vrot.lane.b32.xlu1 %v323_v11, %s1351_s14 }
 0x5b3   :  { %v326_v13 = vpop.permute.xlu1 %325 }
 0x5b4   :  { %1203 = vmatmul.mubr.msk.bf16.vlgmr.msra.gmra.mrb[4].mxu0 %vm168_vm6, %v326_v13 }
 0x5b5   :  { %1215 = vmatpush3.bf16.msra.mxu0 %v1408_v5  ;;  %1218 = vmatprep.mubr.msk.bf16.mxu0 %vm1347_vm2, %v1346_v4 }
 0x5b6   :  { %1216 = vmatprep.subr.bf16.mxu0 %v1346_v4 }
 0x5b9   :  { %1217 = vmatpush3.bf16.msra.mxu0 %v1423_v8 }
 0x5ba   :  { %1230 = vmatprep.subr.bf16.mxu0 %v1346_v4 }
 0x687   :  { %v364_v15 = vpop.f32.mrb[4].mxu0 }
 0x688   :  { %v370_v16 = vadd.f32 %v364_v15, %v1452_v18  ;;  %v1204_v19 = vpop.f32.mrb[5].mxu0 }
 0x689   :  { %v367_v20 = vpop.f32.mrb[6].mxu0 }
 0x68a   :  { %v1119_v22 = vmul.f32 -1.442695, %v370_v16  ;;  %v1205_v23 = vpop.f32.mrb[7].mxu0 }
 0x68c   :  { %1292 = vpow2.f32 %v1119_v22 }
 0x696   :  { %v1293_v25 = vpop.eup %1292 }
 0x697   :  { %v374_v26 = vadd.f32 1.0, %v1293_v25 }
 0x699   :  { %1294 = vrcp.f32 %v374_v26 }
 0x6a3   :  { %v1295_v27 = vpop.eup %1294 }
 0x6a4   :  { %v377_v28 = vmul.f32 %v1295_v27, %v1458_v38 }
 0x6a6   :  { %v378_v29 = vadd.f32 %v377_v28, %v1461_v40 }
 0x6a8   :  { %381 = vrot.lane.b32.xlu0 %v378_v29, %s1350_s3  ;;  %v379_v18 = vmul.f32 %v378_v29, %v310_v6 }
 0x71a   :  { %v382_v30 = vpop.permute.xlu0 %381 }
 0x71b   :  { %v384_v31 = vmul.f32 %v382_v30, %v378_v29 }
 0x71d   :  { %386 = vrot.lane.b32.xlu1 %v384_v31, %s1351_s14 }
 0x78f   :  { %v387_v32 = vpop.permute.xlu1 %386 }
 0x790   :  { %v389_v33 = vadd.f32 %v387_v32, %v379_v18 }
 0x792   :  { %1296 = vtanh.f32 %v389_v33 }
 0x79c   :  { %v1297_v34 = vpop.eup %1296 }
 0x79d   :  { %392 = vrot.lane.b32.xlu0 %v1297_v34, %s1350_s3 }
 0x80f   :  { %v393_v35 = vpop.permute.xlu0 %392 }
 0x810   :  { %v1503_v36 = vmul.f32 %v393_v35, %v378_v29 }
 0x812   :  { %v402_v37 = vpack.c.bf16 %v1503_v36, %v1503_v36 }
 0x814   :  { %404 = vrot.lane.b32.xlu1 %v402_v37, %s1351_s14 }
 0x886   :  { %v405_v39 = vpop.permute.xlu1 %404 }
 0x887   :  { %1211 = vmatmul.mubr.msk.bf16.vlgmr.msra.gmra.mrb[12].mxu1 %vm168_vm6, %v405_v39 }
 0x888   :  { %1223 = vmatpush3.bf16.msra.mxu1 %v1408_v5  ;;  %1226 = vmatprep.mubr.msk.bf16.mxu1 %vm1347_vm2, %v1346_v4 }
 0x889   :  { %1224 = vmatprep.subr.bf16.mxu1 %v1346_v4 }
 0x88c   :  { %1225 = vmatpush3.bf16.msra.mxu1 %v1423_v8 }
 0x88d   :  { %1238 = vmatprep.subr.bf16.mxu1 %v1346_v4 }
 0x95a   :  { %v443_v41 = vpop.f32.mrb[12].mxu1 }
 0x95b   :  { %v449_v42 = vadd.f32 %v443_v41, %v1456_v24  ;;  %v1212_v43 = vpop.f32.mrb[13].mxu1 }
 0x95c   :  { %v446_v44 = vpop.f32.mrb[14].mxu1 }
 0x95d   :  { %v1121_v45 = vmul.f32 -1.442695, %v449_v42  ;;  %v1213_v46 = vpop.f32.mrb[15].mxu1 }
 0x95f   :  { %1298 = vpow2.f32 %v1121_v45 }
 0x969   :  { %v1299_v47 = vpop.eup %1298 }
 0x96a   :  { %v453_v48 = vadd.f32 1.0, %v1299_v47 }
 0x96c   :  { %1300 = vrcp.f32 %v453_v48 }
 0x976   :  { %v1301_v49 = vpop.eup %1300 }
 0x977   :  { %v456_v51 = vmul.f32 %v1301_v49, %v1458_v38 }
 0x979   :  { %v457_v52 = vadd.f32 %v456_v51, %v1461_v40 }
 0x97b   :  { %460 = vrot.lane.b32.xlu0 %v457_v52, %s1350_s3  ;;  %v458_v24 = vmul.f32 %v457_v52, %v389_v33 }
 0x9ed   :  { %v461_v53 = vpop.permute.xlu0 %460 }
 0x9ee   :  { %v463_v54 = vmul.f32 %v461_v53, %v457_v52 }
 0x9f0   :  { %465 = vrot.lane.b32.xlu1 %v463_v54, %s1351_s14 }
 0xa62   :  { %v466_v55 = vpop.permute.xlu1 %465 }
 0xa63   :  { %v468_v56 = vadd.f32 %v466_v55, %v458_v24 }
 0xa65   :  { %1302 = vtanh.f32 %v468_v56 }
 0xa6f   :  { %v1303_v57 = vpop.eup %1302 }
 0xa70   :  { %471 = vrot.lane.b32.xlu0 %v1303_v57, %s1350_s3 }
 0xae2   :  { %v472_v58 = vpop.permute.xlu0 %471 }
 0xae3   :  { %v1521_v59 = vmul.f32 %v472_v58, %v457_v52 }
 0xae5   :  { %v481_v60 = vpack.c.bf16 %v1521_v59, %v1521_v59 }
 0xae7   :  { %483 = vrot.lane.b32.xlu1 %v481_v60, %s1351_s14 }
 0xb59   :  { %v484_v61 = vpop.permute.xlu1 %483 }
 0xb5a   :  { %1219 = vmatmul.mubr.msk.bf16.vlgmr.msra.gmra.mrb[8].mxu0 %vm168_vm6, %v484_v61 }
 0xb5b   :  { %1231 = vmatpush3.bf16.msra.mxu0 %v1408_v5  ;;  %1234 = vmatprep.mubr.msk.bf16.mxu0 %vm1347_vm2, %v1346_v4 }
 0xb5c   :  { %1232 = vmatprep.subr.bf16.mxu0 %v1346_v4 }
 0xb5f   :  { %1233 = vmatpush3.bf16.msra.mxu0 %v1423_v8 }
 0xc2d   :  { %v522_v62 = vpop.f32.mrb[8].mxu0 }
 0xc2e   :  { %v528_v63 = vadd.f32 %v522_v62, %v1448_v14  ;;  %v1220_v0 = vpop.f32.mrb[9].mxu0 }
 0xc2f   :  { %v525_v1 = vpop.f32.mrb[10].mxu0 }
 0xc30   :  { %v1123_v2 = vmul.f32 -1.442695, %v528_v63  ;;  %v1221_v3 = vpop.f32.mrb[11].mxu0 }
 0xc32   :  { %1304 = vpow2.f32 %v1123_v2 }
 0xc3c   :  { %v1305_v6 = vpop.eup %1304 }
 0xc3d   :  { %v532_v7 = vadd.f32 1.0, %v1305_v6 }
 0xc3f   :  { %1306 = vrcp.f32 %v532_v7 }
 0xc49   :  { %v1307_v9 = vpop.eup %1306 }
 0xc4a   :  { %v535_v11 = vmul.f32 %v1307_v9, %v1458_v38 }
 0xc4c   :  { %v536_v13 = vadd.f32 %v535_v11, %v1461_v40 }
 0xc4e   :  { %539 = vrot.lane.b32.xlu0 %v536_v13, %s1350_s3  ;;  %v537_v14 = vmul.f32 %v536_v13, %v468_v56 }
 0xcc0   :  { %v540_v15 = vpop.permute.xlu0 %539 }
 0xcc1   :  { %v542_v16 = vmul.f32 %v540_v15, %v536_v13 }
 0xcc3   :  { %544 = vrot.lane.b32.xlu1 %v542_v16, %s1351_s14 }
 0xd35   :  { %v545_v19 = vpop.permute.xlu1 %544 }
 0xd36   :  { %v547_v20 = vadd.f32 %v545_v19, %v537_v14 }
 0xd38   :  { %1308 = vtanh.f32 %v547_v20 }
 0xd42   :  { %v1309_v22 = vpop.eup %1308 }
 0xd43   :  { %550 = vrot.lane.b32.xlu0 %v1309_v22, %s1350_s3 }
 0xdb5   :  { %v551_v23 = vpop.permute.xlu0 %550 }
 0xdb6   :  { %v1538_v25 = vmul.f32 %v551_v23, %v536_v13 }
 0xdb8   :  { %v560_v26 = vpack.c.bf16 %v1538_v25, %v1538_v25 }
 0xdba   :  { %562 = vrot.lane.b32.xlu1 %v560_v26, %s1351_s14 }
 0xe2c   :  { %v563_v27 = vpop.permute.xlu1 %562 }
 0xe2d   :  { %1227 = vmatmul.mubr.msk.bf16.vlgmr.msra.gmra.mrb[16].mxu1 %vm168_vm6, %v563_v27  ;;  %v396_v27 = vmax.f32 %v1503_v36, 0.0  ;;  %v1278_v36 = vld [vmem:[%s1681_s4] sm:$0xff]  }
 0xe2e   :  { %1239 = vmatpush3.bf16.msra.mxu1 %v1408_v5  ;;  %1242 = vmatprep.mubr.msk.bf16.mxu1 %vm1347_vm2, %v1346_v4 }
 0xe2f   :  { %1240 = vmatprep.subr.bf16.mxu1 %v1346_v4  ;;  %1246 = vmatprep.subr.bf16.mxu0 %v1278_v36 }
 0xe32   :  { %1241 = vmatpush3.bf16.msra.mxu1 %v1423_v8 }
 0xf00   :  { %v601_v28 = vpop.f32.mrb[16].mxu1 }
 0xf01   :  { %v607_v29 = vadd.f32 %v601_v28, %v1454_v21  ;;  %v1228_v30 = vpop.f32.mrb[17].mxu1  ;;  %v554_v28 = vmax.f32 %v1538_v25, 0.0 }
 0xf02   :  { %v604_v31 = vpop.f32.mrb[18].mxu1 }
 0xf03   :  { %v1125_v18 = vmul.f32 -1.442695, %v607_v29  ;;  %v1229_v32 = vpop.f32.mrb[19].mxu1 }
 0xf04   :  { %v1279_v32 = vld [vmem:[%s1681_s4 + $0x8] sm:$0xff]   ;;  %s1352_s4 = smov 1  }
 0xf05   :  { %1310 = vpow2.f32 %v1125_v18 }
 0xf0f   :  { %v1311_v33 = vpop.eup %1310 }
 0xf10   :  { %v611_v34 = vadd.f32 1.0, %v1311_v33  ;;  %v317_v33 = vmax.f32 %v1485_v10, 0.0  ;;  %v911_v10 = vld [vmem:[%s1682_s6 + $0x10] sm:$0xff] }
 0xf12   :  { %1312 = vrcp.f32 %v611_v34 }
 0xf1c   :  { %v1313_v35 = vpop.eup %1312 }
 0xf1d   :  { %v614_v5 = vmul.f32 %v1313_v35, %v1458_v38  ;;  %v475_v35 = vmax.f32 %v1521_v59, 0.0 }
 0xf1f   :  { %v615_v37 = vadd.f32 %v614_v5, %v1461_v40 }
 0xf21   :  { %618 = vrot.lane.b32.xlu0 %v615_v37, %s1350_s3  ;;  %v616_v21 = vmul.f32 %v615_v37, %v547_v20 }
 0xf93   :  { %v619_v4 = vpop.permute.xlu0 %618 }
 0xf94   :  { %v621_v8 = vmul.f32 %v619_v4, %v615_v37 }
 0xf96   :  { %623 = vrot.lane.b32.xlu1 %v621_v8, %s1351_s14  ;;  %v913_v8 = vld [vmem:[%s1682_s6 + $0x20] sm:$0xff] }
0x1008   :  { %v624_v39 = vpop.permute.xlu1 %623 }
0x1009   :  { %v626_v41 = vadd.f32 %v624_v39, %v616_v21 }
0x100b   :  { %1314 = vtanh.f32 %v626_v41 }
0x1015   :  { %v1315_v42 = vpop.eup %1314 }
0x1016   :  { %629 = vrot.lane.b32.xlu0 %v1315_v42, %s1350_s3  ;;  %v910_v42 = vld [vmem:[%s1682_s6 + $0x8] sm:$0xff] }
0x1088   :  { %v630_v43 = vpop.permute.xlu0 %629 }
0x1089   :  { %v1555_v44 = vmul.f32 %v630_v43, %v615_v37  ;;  %v909_v37 = vld [vmem:[%s1682_s6] sm:$0xff] }
0x108b   :  { %v639_v45 = vpack.c.bf16 %v1555_v44, %v1555_v44  ;;  %v633_v5 = vmax.f32 %v1555_v44, 0.0  ;;  %v912_v44 = vld [vmem:[%s1682_s6 + $0x18] sm:$0xff] }
0x108d   :  { %641 = vrot.lane.b32.xlu1 %v639_v45, %s1351_s14 }
0x10ff   :  { %v642_v46 = vpop.permute.xlu1 %641 }
0x1100   :  { %1235 = vmatmul.mubr.msk.bf16.vlgmr.msra.gmra.mrb[12].mxu0 %vm168_vm6, %v642_v46 }
0x1101   :  { %1247 = vmatpush3.bf16.msra.mxu0 %v1278_v36 }
0x1102   :  { %1248 = vmatprep.subr.bf16.mxu0 %v1279_v32 }
0x1105   :  { %1249 = vmatpush3.bf16.msra.mxu0 %v1279_v32 }
0x11d3   :  { %v680_v47 = vpop.f32.mrb[12].mxu0 }
0x11d4   :  { %v686_v48 = vadd.f32 %v680_v47, %v1446_v12  ;;  %v1236_v49 = vpop.f32.mrb[13].mxu0 }
0x11d5   :  { %v683_v51 = vpop.f32.mrb[14].mxu0  ;;  %v914_v49 = vld [vmem:[%s1682_s6 + $0x28] sm:$0xff] }
0x11d6   :  { %v1127_v52 = vmul.f32 -1.442695, %v686_v48  ;;  %v1237_v53 = vpop.f32.mrb[15].mxu0 }
0x11d8   :  { %1316 = vpow2.f32 %v1127_v52 }
0x11e2   :  { %v1317_v54 = vpop.eup %1316 }
0x11e3   :  { %v690_v24 = vadd.f32 1.0, %v1317_v54 }
0x11e5   :  { %1318 = vrcp.f32 %v690_v24 }
0x11ef   :  { %v1319_v55 = vpop.eup %1318 }
0x11f0   :  { %v693_v56 = vmul.f32 %v1319_v55, %v1458_v38 }
0x11f2   :  { %v694_v57 = vadd.f32 %v693_v56, %v1461_v40  ;;  %v916_v56 = vld [vmem:[%s1682_s6 + $0x38] sm:$0xff] }
0x11f4   :  { %697 = vrot.lane.b32.xlu0 %v694_v57, %s1350_s3  ;;  %v695_v12 = vmul.f32 %v694_v57, %v626_v41  ;;  %v915_v41 = vld [vmem:[%s1682_s6 + $0x30] sm:$0xff] }
0x1266   :  { %v698_v58 = vpop.permute.xlu0 %697 }
0x1267   :  { %v700_v60 = vmul.f32 %v698_v58, %v694_v57 }
0x1269   :  { %702 = vrot.lane.b32.xlu1 %v700_v60, %s1351_s14 }
0x12db   :  { %v703_v61 = vpop.permute.xlu1 %702 }
0x12dc   :  { %v705_v62 = vadd.f32 %v703_v61, %v695_v12  ;;  %v1130_v61 = vld [vmem:[%s1683_s5] ss:$0 sm:$0xff] }
0x12de   :  { %1320 = vtanh.f32 %v705_v62 }
0x12e8   :  { %v1321_v63 = vpop.eup %1320 }
0x12e9   :  { %708 = vrot.lane.b32.xlu0 %v1321_v63, %s1350_s3 }
0x135b   :  { %v709_v0 = vpop.permute.xlu0 %708 }
0x135c   :  { %v711_v1 = vmul.f32 %v709_v0, %v694_v57 }
0x135e   :  { %v718_v2 = vpack.c.bf16 %v711_v1, %v711_v1 }
0x1360   :  { %720 = vrot.lane.b32.xlu1 %v718_v2, %s1351_s14 }
0x13d2   :  { %v721_v3 = vpop.permute.xlu1 %720 }
0x13d3   :  { %1243 = vmatmul.mubr.msk.bf16.vlgmr.msra.gmra.mrb[20].mxu1 %vm168_vm6, %v721_v3 }
0x14a6   :  { %v759_v6 = vpop.f32.mrb[20].mxu1 }
0x14a7   :  { %v765_v7 = vadd.f32 %v759_v6, %v1450_v17  ;;  %v1244_v9 = vpop.f32.mrb[21].mxu1  ;;  %v238_v17 = vmax.f32 %v1468_v50, 0.0 }
0x14a8   :  { %v762_v11 = vpop.f32.mrb[22].mxu1 }
0x14a9   :  { %v1129_v13 = vmul.f32 -1.442695, %v765_v7  ;;  %v1245_v15 = vpop.f32.mrb[23].mxu1 }
0x14ab   :  { %1322 = vpow2.f32 %v1129_v13 }
0x14b5   :  { %v1323_v16 = vpop.eup %1322 }
0x14b6   :  { %v769_v14 = vadd.f32 1.0, %v1323_v16 }
0x14b8   :  { %1324 = vrcp.f32 %v769_v14 }
0x14c2   :  { %v1325_v19 = vpop.eup %1324 }
0x14c3   :  { %v772_v20 = vmul.f32 %v1325_v19, %v1458_v38  ;;  %v712_v38 = vmax.f32 %v711_v1, 0.0 }
0x14c5   :  { %v773_v22 = vadd.f32 %v772_v20, %v1461_v40 }
0x14c7   :  { %776 = vrot.lane.b32.xlu0 %v773_v22, %s1350_s3  ;;  %v774_v40 = vmul.f32 %v773_v22, %v705_v62 }
0x1539   :  { %v777_v23 = vpop.permute.xlu0 %776 }
0x153a   :  { %v779_v26 = vmul.f32 %v777_v23, %v773_v22 }
0x153c   :  { %781 = vrot.lane.b32.xlu1 %v779_v26, %s1351_s14 }
0x1540   :  { %240 = vrot.lane.b32.xlu1 %v238_v17, %s1351_s14 }
0x1544   :  { %398 = vrot.lane.b32.xlu1 %v396_v27, %s1351_s14 }
0x1548   :  { %556 = vrot.lane.b32.xlu1 %v554_v28, %s1351_s14 }
0x154c   :  { %714 = vrot.lane.b32.xlu1 %v712_v38, %s1351_s14 }
0x1550   :  { %925 = vrot.lane.b32.xlu1 %v909_v37, %s1352_s4 }
0x1554   :  { %929 = vrot.lane.b32.xlu1 %v911_v10, %s1352_s4 }
0x1558   :  { %933 = vrot.lane.b32.xlu1 %v913_v8, %s1352_s4  ;;  %v1353_v8 = vmov 1  }
0x1559   :  { %1270 = vset.pattern.permute.xlu1 %v1353_v8  ;;  %1271 = vset.pattern.permute.xlu0 %v1353_v8 }
0x155c   :  { %937 = vrot.lane.b32.xlu1 %v915_v41, %s1352_s4 }
0x15ae   :  { %v782_v29 = vpop.permute.xlu1 %781 }
0x15af   :  { %v784_v30 = vadd.f32 %v782_v29, %v774_v40 }
0x15b1   :  { %1326 = vtanh.f32 %v784_v30 }
0x15b2   :  { %v241_v31 = vpop.permute.xlu1 %240 }
0x15b3   :  { %243 = vst.msk [vmem:[#allocation2] sm:$0xff] %vm168_vm6, %v241_v31 }
0x15b6   :  { %v399_v50 = vpop.permute.xlu1 %398 }
0x15b7   :  { %401 = vst.msk [vmem:[#allocation2 + $0x10] sm:$0xff] %vm168_vm6, %v399_v50 }
0x15ba   :  { %v557_v25 = vpop.permute.xlu1 %556  ;;  %v797_v46 = vld [vmem:[#allocation2] sm:$0xff] }
0x15bb   :  { %v1327_v18 = vpop.eup %1326  ;;  %559 = vst.msk [vmem:[#allocation2 + $0x20] sm:$0xff] %vm168_vm6, %v557_v25 }
0x15bc   :  { %787 = vrot.lane.b32.xlu0 %v1327_v18, %s1350_s3 }
0x15be   :  { %v715_v34 = vpop.permute.xlu1 %714  ;;  %v799_v51 = vld [vmem:[#allocation2 + $0x10] sm:$0xff] }
0x15bf   :  { %717 = vst.msk [vmem:[#allocation2 + $0x30] sm:$0xff] %vm168_vm6, %v715_v34 }
0x15c0   :  { %319 = vrot.lane.b32.xlu0 %v317_v33, %s1351_s14 }
0x15c2   :  { %v801_v54 = vld [vmem:[#allocation2 + $0x20] sm:$0xff]  ;;  %v926_v9 = vpop.permute.xlu1 %925 }
0x15c4   :  { %477 = vrot.lane.b32.xlu0 %v475_v35, %s1351_s14 }
0x15c6   :  { %v803_v58 = vld [vmem:[#allocation2 + $0x30] sm:$0xff]  ;;  %v930_v13 = vpop.permute.xlu1 %929 }
0x15c8   :  { %635 = vrot.lane.b32.xlu0 %v633_v5, %s1351_s14 }
0x15ca   :  { %v934_v16 = vpop.permute.xlu1 %933 }
0x15ce   :  { %v938_v20 = vpop.permute.xlu1 %937 }
0x162e   :  { %v788_v59 = vpop.permute.xlu0 %787 }
0x162f   :  { %v790_v4 = vmul.f32 %v788_v59, %v773_v22 }
0x1631   :  { %v791_v21 = vmax.f32 %v790_v4, 0.0 }
0x1632   :  { %v320_v39 = vpop.permute.xlu0 %319 }
0x1633   :  { %322 = vst.msk [vmem:[#allocation2 + $0x8] sm:$0xff] %vm168_vm6, %v320_v39  ;;  %793 = vrot.lane.b32.xlu0 %v791_v21, %s1351_s14 }
0x1636   :  { %v478_v43 = vpop.permute.xlu0 %477 }
0x1637   :  { %480 = vst.msk [vmem:[#allocation2 + $0x18] sm:$0xff] %vm168_vm6, %v478_v43  ;;  %927 = vrot.lane.b32.xlu0 %v910_v42, %s1352_s4 }
0x163a   :  { %v636_v45 = vpop.permute.xlu0 %635  ;;  %v798_v47 = vld [vmem:[#allocation2 + $0x8] sm:$0xff] }
0x163b   :  { %638 = vst.msk [vmem:[#allocation2 + $0x28] sm:$0xff] %vm168_vm6, %v636_v45  ;;  %v805_v48 = vpack.c.bf16 %v798_v47, %v797_v46  ;;  %931 = vrot.lane.b32.xlu0 %v912_v44, %s1352_s4 }
0x163d   :  { %1250 = vmatprep.mubr.msk.bf16.mxu0 %vm168_vm6, %v805_v48 }
0x163e   :  { %v800_v52 = vld [vmem:[#allocation2 + $0x18] sm:$0xff] }
0x163f   :  { %v806_v53 = vpack.c.bf16 %v800_v52, %v799_v51  ;;  %935 = vrot.lane.b32.xlu0 %v914_v49, %s1352_s4 }
0x1641   :  { %1251 = vmatmul.mubr.msk.bf16.vlgmr.msra.gmra.mrb[16].mxu0 %vm168_vm6, %v806_v53 }
0x1642   :  { %v802_v24 = vld [vmem:[#allocation2 + $0x28] sm:$0xff] }
0x1643   :  { %v807_v55 = vpack.c.bf16 %v802_v24, %v801_v54  ;;  %939 = vrot.lane.b32.xlu0 %v916_v56, %s1352_s4 }
0x1645   :  { %1254 = vmatprep.mubr.msk.bf16.mxu0 %vm168_vm6, %v807_v55 }
0x16a5   :  { %v794_v57 = vpop.permute.xlu0 %793 }
0x16a6   :  { %796 = vst.msk [vmem:[#allocation2 + $0x38] sm:$0xff] %vm168_vm6, %v794_v57 }
0x16a9   :  { %v928_v11 = vpop.permute.xlu0 %927 }
0x16ad   :  { %v804_v60 = vld [vmem:[#allocation2 + $0x38] sm:$0xff]  ;;  %v932_v15 = vpop.permute.xlu0 %931 }
0x16ae   :  { %v808_v12 = vpack.c.bf16 %v804_v60, %v803_v58 }
0x16b0   :  { %1255 = vmatmul.mubr.msk.bf16.gmra.mrb[20].mxu0 %vm168_vm6, %v808_v12 }
0x16b1   :  { %v936_v14 = vpop.permute.xlu0 %935 }
0x16b5   :  { %v940_v38 = vpop.permute.xlu0 %939 }
0x1714   :  { %v1252_v62 = vpop.f32.mrb[16].mxu0 }
0x1715   :  { %v878_v63 = vpop.f32.mrb[17].mxu0  ;;  %v887_v6 = vadd.f32 %v1252_v62, %v1130_v61 }
0x1716   :  { %v879_v0 = vadd.f32 %v1130_v61, %v878_v63  ;;  %v1253_v1 = vpop.f32.mrb[18].mxu0 }
0x1717   :  { %v881_v2 = vpop.f32.mrb[19].mxu0  ;;  %v890_v7 = vadd.f32 %v1253_v1, %v1130_v61  ;;  %v951_v23 = vadd.f32 %v930_v13, %v887_v6 }
0x1718   :  { %v882_v3 = vadd.f32 %v1130_v61, %v881_v2  ;;  %1041 = vrot.lane.b32.xlu1 %v879_v0, %s1352_s4  ;;  %v949_v22 = vadd.f32 %v926_v9, %v879_v0 }
0x1719   :  { %v952_v40 = vadd.f32 %v932_v15, %v890_v7  ;;  %v960_v32 = vsel %vm957_vm7, %v951_v23, -inf }
0x171a   :  { %1043 = vrot.lane.b32.xlu0 %v882_v3, %s1352_s4  ;;  %v950_v50 = vadd.f32 %v928_v11, %v882_v3  ;;  %v958_v18 = vsel %vm957_vm7, %v949_v22, -inf }
0x171b   :  { %v961_v10 = vsel %vm957_vm7, %v952_v40, -inf }
0x171c   :  { %1045 = vrot.lane.b32.xlu1 %v887_v6, %s1352_s4  ;;  %v959_v21 = vsel %vm957_vm7, %v950_v50, -inf }
0x171e   :  { %1047 = vrot.lane.b32.xlu0 %v890_v7, %s1352_s4 }
0x1783   :  { %v1256_v19 = vpop.f32.mrb[20].mxu0 }
0x1784   :  { %v903_v26 = vadd.f32 %v1256_v19, %v1130_v61  ;;  %v894_v17 = vpop.f32.mrb[21].mxu0 }
0x1785   :  { %v895_v27 = vadd.f32 %v1130_v61, %v894_v17  ;;  %v1257_v28 = vpop.f32.mrb[22].mxu0 }
0x1786   :  { %v906_v29 = vadd.f32 %v1257_v28, %v1130_v61  ;;  %v955_v30 = vadd.f32 %v938_v20, %v903_v26  ;;  %v897_v31 = vpop.f32.mrb[23].mxu0 }
0x1787   :  { %v953_v36 = vadd.f32 %v934_v16, %v895_v27  ;;  %v898_v25 = vadd.f32 %v1130_v61, %v897_v31  ;;  %1049 = vrot.lane.b32.xlu1 %v895_v27, %s1352_s4 }
0x1788   :  { %v966_v33 = vsel %vm957_vm7, %v955_v30, -inf  ;;  %v956_v34 = vadd.f32 %v940_v38, %v906_v29 }
0x1789   :  { %v962_v35 = vsel %vm957_vm7, %v953_v36, -inf  ;;  %v967_v5 = vmax.f32 %v960_v32, %v966_v33  ;;  %v954_v37 = vadd.f32 %v936_v14, %v898_v25  ;;  %1051 = vrot.lane.b32.xlu0 %v898_v25, %s1352_s4 }
0x178a   :  { %v963_v59 = vmax.f32 %v958_v18, %v962_v35  ;;  %v968_v4 = vsel %vm957_vm7, %v956_v34, -inf }
0x178b   :  { %v964_v39 = vsel %vm957_vm7, %v954_v37, -inf  ;;  %v969_v41 = vmax.f32 %v961_v10, %v968_v4  ;;  %1053 = vrot.lane.b32.xlu1 %v903_v26, %s1352_s4 }
0x178c   :  { %v965_v42 = vmax.f32 %v959_v21, %v964_v39 }
0x178d   :  { %v971_v43 = vmax.f32 %v967_v5, %v969_v41  ;;  %1055 = vrot.lane.b32.xlu0 %v906_v29, %s1352_s4  ;;  %v1042_v5 = vpop.permute.xlu1 %1041 }
0x178e   :  { %v970_v44 = vmax.f32 %v963_v59, %v965_v42 }
0x1790   :  { %v972_v45 = vmax.f32 %v970_v44, %v971_v43 }
0x1791   :  { %v1046_v39 = vpop.permute.xlu1 %1045 }
0x1792   :  { %v973_v46 = vrot.slane %v972_v45, 4 }
0x1794   :  { %v974_v47 = vmax.f32 %v972_v45, %v973_v46 }
0x1796   :  { %v975_v48 = vrot.slane %v974_v47, 2 }
0x1798   :  { %v976_v49 = vmax.f32 %v974_v47, %v975_v48 }
0x179a   :  { %v977_v51 = vrot.slane %v976_v49, 1 }
0x179c   :  { %v978_v52 = vmax.f32 %v976_v49, %v977_v51 }
0x179e   :  { %v980_v53 = vsub.f32 %v950_v50, %v978_v52  ;;  %v981_v54 = vsub.f32 %v951_v23, %v978_v52  ;;  %v982_v24 = vsub.f32 %v952_v40, %v978_v52  ;;  %v983_v55 = vsub.f32 %v953_v36, %v978_v52 }
0x179f   :  { %v984_v56 = vsub.f32 %v954_v37, %v978_v52  ;;  %v985_v57 = vsub.f32 %v955_v30, %v978_v52  ;;  %v986_v58 = vsub.f32 %v956_v34, %v978_v52  ;;  %v979_v60 = vsub.f32 %v949_v22, %v978_v52  ;;  %v1044_v37 = vpop.permute.xlu0 %1043 }
0x17a0   :  { %v989_v12 = vmul.f32 1.442695, %v980_v53  ;;  %v991_v61 = vmul.f32 1.442695, %v981_v54  ;;  %v993_v63 = vmul.f32 1.442695, %v982_v24 }
0x17a1   :  { %v987_v62 = vmul.f32 1.442695, %v979_v60  ;;  %v995_v0 = vmul.f32 1.442695, %v983_v55  ;;  %v997_v1 = vmul.f32 1.442695, %v984_v56 }
0x17a2   :  { %1328 = vpow2.f32 %v989_v12  ;;  %v999_v2 = vmul.f32 1.442695, %v985_v57  ;;  %v1001_v6 = vmul.f32 1.442695, %v986_v58 }
0x17a3   :  { %1330 = vpow2.f32 %v991_v61  ;;  %v1048_v48 = vpop.permute.xlu0 %1047 }
0x17a4   :  { %1332 = vpow2.f32 %v987_v62 }
0x17a5   :  { %1334 = vpow2.f32 %v993_v63 }
0x17a6   :  { %1336 = vpow2.f32 %v995_v0 }
0x17a7   :  { %1338 = vpow2.f32 %v997_v1 }
0x17a8   :  { %1340 = vpow2.f32 %v999_v2 }
0x17a9   :  { %1342 = vpow2.f32 %v1001_v6 }
0x17ac   :  { %v1329_v3 = vpop.eup %1328 }
0x17ad   :  { %v1331_v7 = vpop.eup %1330  ;;  %v1004_v9 = vsel %vm957_vm7, %v1329_v3, 0.0 }
0x17ae   :  { %v1333_v11 = vpop.eup %1332  ;;  %v1006_v14 = vsel %vm957_vm7, %v1331_v7, 0.0 }
0x17af   :  { %v1003_v13 = vsel %vm957_vm7, %v1333_v11, 0.0  ;;  %v1335_v15 = vpop.eup %1334 }
0x17b0   :  { %v1005_v16 = vadd.f32 %v1004_v9, %v1003_v13  ;;  %v1337_v19 = vpop.eup %1336  ;;  %v1008_v22 = vsel %vm957_vm7, %v1335_v15, 0.0 }
0x17b1   :  { %v1339_v23 = vpop.eup %1338  ;;  %v1010_v17 = vsel %vm957_vm7, %v1337_v19, 0.0 }
0x17b2   :  { %v1007_v20 = vadd.f32 %v1006_v14, %v1005_v16  ;;  %v1341_v27 = vpop.eup %1340  ;;  %v1012_v38 = vsel %vm957_vm7, %v1339_v23, 0.0 }
0x17b3   :  { %v1343_v40 = vpop.eup %1342  ;;  %v1014_v30 = vsel %vm957_vm7, %v1341_v27, 0.0 }
0x17b4   :  { %v1009_v26 = vadd.f32 %v1008_v22, %v1007_v20  ;;  %v1016_v50 = vsel %vm957_vm7, %v1343_v40, 0.0 }
0x17b6   :  { %v1011_v28 = vadd.f32 %v1010_v17, %v1009_v26 }
0x17b8   :  { %v1013_v29 = vadd.f32 %v1012_v38, %v1011_v28 }
0x17ba   :  { %v1015_v31 = vadd.f32 %v1014_v30, %v1013_v29 }
0x17bc   :  { %v1017_v36 = vadd.f32 %v1016_v50, %v1015_v31 }
0x17be   :  { %v1018_v25 = vrot.slane %v1017_v36, 4 }
0x17c0   :  { %v1019_v18 = vadd.f32 %v1018_v25, %v1017_v36 }
0x17c2   :  { %v1020_v32 = vrot.slane %v1019_v18, 2 }
0x17c4   :  { %v1021_v33 = vadd.f32 %v1020_v32, %v1019_v18 }
0x17c6   :  { %v1022_v34 = vrot.slane %v1021_v33, 1 }
0x17c8   :  { %v1023_v35 = vadd.f32 %v1022_v34, %v1021_v33 }
0x17ca   :  { %1344 = vrcp.f32 %v1023_v35 }
0x17d4   :  { %v1345_v10 = vpop.eup %1344 }
0x17d5   :  { %v1025_v59 = vmul.f32 %v1345_v10, %v1333_v11  ;;  %v1026_v4 = vmul.f32 %v1345_v10, %v1329_v3  ;;  %v1027_v8 = vmul.f32 %v1345_v10, %v1331_v7  ;;  %v1028_v21 = vmul.f32 %v1345_v10, %v1335_v15 }
0x17d6   :  { %v1029_v41 = vmul.f32 %v1345_v10, %v1337_v19  ;;  %v1030_v42 = vmul.f32 %v1345_v10, %v1339_v23  ;;  %v1031_v43 = vmul.f32 %v1345_v10, %v1341_v27  ;;  %v1032_v44 = vmul.f32 %v1345_v10, %v1343_v40 }
0x17d7   :  { %v1065_v45 = vmul.f32 %v1042_v5, %v1025_v59  ;;  %v1066_v46 = vmul.f32 %v1044_v37, %v1026_v4  ;;  %v1067_v47 = vmul.f32 %v1046_v39, %v1027_v8  ;;  %v1068_v52 = vmul.f32 %v1048_v48, %v1028_v21 }
0x17d9   :  { %v1073_v49 = vsel %vm957_vm7, %v1065_v45, 0.0  ;;  %v1074_v51 = vsel %vm957_vm7, %v1066_v46, 0.0  ;;  %v1076_v54 = vsel %vm957_vm7, %v1067_v47, 0.0  ;;  %v1078_v55 = vsel %vm957_vm7, %v1068_v52, 0.0 }
0x17da   :  { %v1075_v53 = vadd.f32 %v1074_v51, %v1073_v49 }
0x17dc   :  { %v1077_v24 = vadd.f32 %v1076_v54, %v1075_v53 }
0x17de   :  { %v1079_v56 = vadd.f32 %v1078_v55, %v1077_v24 }
0x17f9   :  { %v1050_v57 = vpop.permute.xlu1 %1049 }
0x17fa   :  { %v1069_v58 = vmul.f32 %v1050_v57, %v1029_v41 }
0x17fb   :  { %v1052_v60 = vpop.permute.xlu0 %1051 }
0x17fc   :  { %v1080_v12 = vsel %vm957_vm7, %v1069_v58, 0.0  ;;  %v1070_v61 = vmul.f32 %v1052_v60, %v1030_v42 }
0x17fd   :  { %v1081_v62 = vadd.f32 %v1080_v12, %v1079_v56  ;;  %v1054_v63 = vpop.permute.xlu1 %1053 }
0x17fe   :  { %v1082_v0 = vsel %vm957_vm7, %v1070_v61, 0.0  ;;  %v1071_v1 = vmul.f32 %v1054_v63, %v1031_v43 }
0x17ff   :  { %v1083_v2 = vadd.f32 %v1082_v0, %v1081_v62  ;;  %v1056_v3 = vpop.permute.xlu0 %1055 }
0x1800   :  { %v1084_v6 = vsel %vm957_vm7, %v1071_v1, 0.0  ;;  %v1072_v7 = vmul.f32 %v1056_v3, %v1032_v44 }
0x1801   :  { %v1085_v9 = vadd.f32 %v1084_v6, %v1083_v2 }
0x1802   :  { %v1086_v11 = vsel %vm957_vm7, %v1072_v7, 0.0 }
0x1803   :  { %v1087_v13 = vadd.f32 %v1086_v11, %v1085_v9 }
0x1805   :  { %v1088_v15 = vrot.slane %v1087_v13, 4 }
0x1807   :  { %v1089_v16 = vadd.f32 %v1088_v15, %v1087_v13 }
0x1809   :  { %v1090_v14 = vrot.slane %v1089_v16, 2 }
0x180b   :  { %v1091_v19 = vadd.f32 %v1090_v14, %v1089_v16 }
0x180d   :  { %v1092_v20 = vrot.slane %v1091_v19, 1 }
0x180f   :  { %v1093_v22 = vadd.f32 %v1092_v20, %v1091_v19 }
0x1811   :  { %1096 = vperm.xlu1 %1270, %v1093_v22  }
0x1890   :  { %v1097_v23 = vpop.permute.xlu1 %1096 }
0x1891   :  { %1099 = vst [vmem:[%s1684_s7] sm:$0xff] %v1097_v23 }

</bundles_post_ra>
